<compile_context>
chip_gen: v5e
topology: v5e:2x2
jax: 0.10.0
libtpu: 0.0.40
codegen_flags: <defaults>
</compile_context>

<pallas_src>
import numpy as np
import jax
import jax.numpy as jnp
from jax import lax
from jax.experimental import pallas as pl
from jax.experimental.pallas import tpu as pltpu

# ---------------- model dims (small, consistent with the module) ----------------
N = 8                 # batch
X_DIM = 32
C_EMBED_DIM = 16
Y_OHE_DIM = 4
HIDDEN_DIM = 32
EMBED_DIM = 16
LAYERS = 2            # backbone hidden layers
CRITIC_HIDDEN = 512   # hardcoded in ConceptCLSUP.__init__
CRITIC_LAYERS = 1

# ---- static row layout of the packed critic slab (width = CRITIC_HIDDEN) ----
W1ZX_ROW = 0                                   # rows [0, 16)   : w1 rows for z_x
W1YO_ROW = EMBED_DIM                           # rows [16, 24)  : w1 rows for y_ohe (4 real + 4 zero)
W1ZC_ROW = EMBED_DIM + 8                       # rows [24, 40)  : w1 rows for z_c
B1_ROW = W1ZC_ROW + C_EMBED_DIM                # row 40 : b1
B2_ROW = B1_ROW + 1                            # row 41 : b2
W3T_ROW = B2_ROW + 1                           # row 42 : w3ᵀ
B3_ROW = W3T_ROW + 1                           # row 43 : b3 (lane 0)
CRITIC_SLAB_ROWS = 48                          # padded to a multiple of 8

# ---- static lane layout of the packed activation slab (width = 128) ----
XC_OFF = 0                                     # lanes [0, 32)  : x
ZC_OFF = X_DIM                                 # lanes [32, 48) : z_c
YO_OFF = X_DIM + C_EMBED_DIM                   # lanes [48, 56) : one_hot(y) (4 real + 4 zero)
INP_LANES = 128


# ---------------------------------------------------------------------------
# Fused kernel: backbone + linears_infonce + InfoNCE critic + final score.
# ---------------------------------------------------------------------------
def make_fused_kernel(stack_meta, n):
    """stack_meta: tuple of (w_row_off, fan_in, b_row_off, relu) — static ints."""

    def kernel(in_ref, stack_ref, critic_ref, w2_ref, out_ref):
        # ---- one lane-dense load of the packed activation slab ----
        inp = in_ref[...]                                                    # (N, 128)
        z_c = inp[:, ZC_OFF:ZC_OFF + C_EMBED_DIM]                            # (N, 16)
        y_ohe = inp[:, YO_OFF:YO_OFF + 8]                                    # (N, 8) 4 real + 4 zero lanes

        # ---- backbone + linears_infonce (small fused MXU matmuls) ----
        # weights are lane-padded to 128 (zeros beyond fan_out), so the padded
        # lanes of h stay exactly zero through bias/relu.
        h = inp[:, XC_OFF:XC_OFF + X_DIM]                                    # (N, 32)
        for (w_off, fi, b_off, relu) in stack_meta:
            hin = h if h.shape[1] == fi else h[:, :fi]
            w = stack_ref[w_off:w_off + fi, :]                               # (fi, 128)
            h = (jnp.dot(hin, w, preferred_element_type=jnp.float32)
                 + stack_ref[b_off:b_off + 1, :])                            # (N, 128)
            if relu:
                h = jnp.maximum(h, 0.0)
        z_x = h[:, :EMBED_DIM]                                               # (N, 16)

        # ---- critic small params from the packed slab (static row slices) ----
        w1zx = critic_ref[W1ZX_ROW:W1ZX_ROW + EMBED_DIM, :]                  # (16, 512)
        w1yo = critic_ref[W1YO_ROW:W1YO_ROW + 8, :]                          # (8, 512) rows 4:8 are zero
        w1zc = critic_ref[W1ZC_ROW:W1ZC_ROW + C_EMBED_DIM, :]                # (16, 512)
        b1 = critic_ref[B1_ROW:B1_ROW + 1, :]                                # (1, 512)
        b2 = critic_ref[B2_ROW:B2_ROW + 1, :]                                # (1, 512)
        w3t = critic_ref[W3T_ROW:W3T_ROW + 1, :]                             # (1, 512)
        b3 = critic_ref[B3_ROW:B3_ROW + 1, 0:1]                              # (1, 1)

        # ---- critic layer 1: concat([z_x, y_ohe, z_c]) via split weights ----
        # b1 folded into the (N, 512) xs-part (cheaper than adding it on (N,N,512)).
        A = (jnp.dot(z_x, w1zx, preferred_element_type=jnp.float32)
             + jnp.dot(y_ohe, w1yo, preferred_element_type=jnp.float32)
             + b1)                                                           # (N, 512)
        Bm = jnp.dot(z_c, w1zc, preferred_element_type=jnp.float32)          # (N, 512)

        # All pairs: pre[i, j, :] = A[j] + Bm[i], i.e. T1[i,j] = f(xs[j], z_c[i]).
        pre = A[None, :, :] + Bm[:, None, :]                                 # (N, N, 512)
        h1 = jnp.maximum(pre.reshape(n * n, CRITIC_HIDDEN), 0.0)             # (N*N, 512)

        # ---- critic layer 2: ONE batched bf16 x bf16 MXU dot, f32 accumulation ----
        h2 = jnp.maximum(
            jnp.dot(h1.astype(jnp.bfloat16), w2_ref[...],
                    preferred_element_type=jnp.float32) + b2, 0.0)           # (N*N, 512)

        # ---- critic layer 3 (512 -> 1) as an elementwise mul + lane reduce (XLU) ----
        prod = h2 * w3t                                                      # (N*N, 512)
        t1 = jnp.sum(prod.reshape(n, n, CRITIC_HIDDEN), axis=-1) + b3        # (N, N)

        # ---- T0 = diag(T1); per-row logsumexp on the lane axis; final score ----
        rows = lax.broadcasted_iota(jnp.int32, (n, n), 0)
        cols = lax.broadcasted_iota(jnp.int32, (n, n), 1)
        diag = jnp.where(rows == cols, t1, 0.0)
        t0_mean = jnp.sum(jnp.sum(diag, axis=-1, keepdims=True),
                          axis=0, keepdims=True) * (1.0 / n)                 # (1, 1)

        m = jnp.max(t1, axis=-1, keepdims=True)                              # (N, 1)
        lse = m + jnp.log(jnp.sum(jnp.exp(t1 - m), axis=-1, keepdims=True))  # (N, 1)
        lse_mean = jnp.sum(lse, axis=0, keepdims=True) * (1.0 / n)           # (1, 1)

        lower_bound = t0_mean - (lse_mean - np.log(float(n)))
        out_ref[...] = -lower_bound

    return kernel


# ---------------------------------------------------------------------------
# Host-side packing (in a real model this runs ONCE at init, not per call).
# ---------------------------------------------------------------------------
def pack_stack(stack_params):
    """Pack backbone + linears_infonce Linear layers into one (rows, 128) f32 slab."""
    blocks, meta, off = [], [], 0
    for (w, b, act) in stack_params:
        fi, fo = w.shape
        blocks.append(jnp.pad(w, ((0, 0), (0, 128 - fo))))     # (fi, 128) lane-padded
        blocks.append(jnp.pad(b, ((0, 0), (0, 128 - fo))))     # (1, 128)
        rows = fi + 1
        pad_rows = (-rows) % 8                                  # keep next weight 8-row aligned
        if pad_rows:
            blocks.append(jnp.zeros((pad_rows, 128), jnp.float32))
        meta.append((off, fi, off + fi, act))
        off += rows + pad_rows
    return jnp.concatenate(blocks, axis=0), tuple(meta)


def pack_critic(critic_p):
    """Pack the small critic params into one (48, 512) f32 slab; w2 as bf16."""
    (w1, b1, _), (w2, b2, _), (w3, b3, _) = critic_p
    w1zx = w1[:EMBED_DIM, :]                                                    # (16, 512)
    w1yo = jnp.pad(w1[EMBED_DIM:EMBED_DIM + Y_OHE_DIM, :],
                   ((0, 8 - Y_OHE_DIM), (0, 0)))                                # (8, 512)
    w1zc = w1[EMBED_DIM + Y_OHE_DIM:, :]                                        # (16, 512)
    w3t = jnp.transpose(w3)                                                     # (1, 512)
    b3row = jnp.pad(b3, ((0, 0), (0, CRITIC_HIDDEN - 1)))                       # (1, 512), b3 at lane 0
    slab = jnp.concatenate(
        [w1zx, w1yo, w1zc, b1, b2, w3t, b3row,
         jnp.zeros((CRITIC_SLAB_ROWS - 44, CRITIC_HIDDEN), jnp.float32)], axis=0)
    return slab, w2.astype(jnp.bfloat16)


def pack_inputs(x, z_c, y):
    """Pack [x | z_c | one_hot(y) | pad] into one (N, 128) lane-dense f32 slab."""
    n = x.shape[0]
    y_ohe = (y.astype(jnp.int32)
             == jnp.arange(Y_OHE_DIM, dtype=jnp.int32)[None, :]).astype(jnp.float32)  # (N, 4)
    y_ohe_p = jnp.pad(y_ohe, ((0, 0), (0, 8 - Y_OHE_DIM)))                              # (N, 8)
    lane_pad = INP_LANES - (X_DIM + C_EMBED_DIM + 8)
    return jnp.concatenate(
        [x, z_c, y_ohe_p, jnp.zeros((n, lane_pad), jnp.float32)], axis=1)               # (N, 128)


def concept_clsup_forward(x, z_c, y, backbone_p, lin_p, critic_p):
    n = x.shape[0]
    stack = list(backbone_p) + list(lin_p)

    stack_slab, stack_meta = pack_stack(stack)
    critic_slab, w2_bf16 = pack_critic(critic_p)
    inp_slab = pack_inputs(x, z_c, y)

    flops = sum(2 * n * w.shape[0] * w.shape[1] for (w, _, _) in stack)
    flops += 2 * n * (EMBED_DIM + Y_OHE_DIM + C_EMBED_DIM) * CRITIC_HIDDEN   # critic layer 1 (split dots)
    flops += 2 * n * n * CRITIC_HIDDEN * CRITIC_HIDDEN                       # batched all-pairs layer 2
    flops += 2 * n * n * CRITIC_HIDDEN                                       # layer 3 lane reduction
    bytes_accessed = (int(inp_slab.size) * 4 + int(stack_slab.size) * 4
                      + int(critic_slab.size) * 4 + int(w2_bf16.size) * 2 + 4)

    vmem = pl.BlockSpec(memory_space=pltpu.MemorySpace.VMEM)
    score = pl.pallas_call(
        make_fused_kernel(stack_meta, n),
        out_shape=jax.ShapeDtypeStruct((1, 1), jnp.float32),
        in_specs=[vmem, vmem, vmem, vmem],
        out_specs=vmem,
        compiler_params=pltpu.CompilerParams(vmem_limit_bytes=32 * 1024 * 1024),
        cost_estimate=pl.CostEstimate(flops=int(flops),
                                      transcendentals=int(n * n + n),
                                      bytes_accessed=int(bytes_accessed)),
    )(inp_slab, stack_slab, critic_slab, w2_bf16)
    return score[0, 0]


# ---------------------------------------------------------------------------
# Parameter init (deterministic, PyTorch-Linear-like uniform).
# ---------------------------------------------------------------------------
def init_linear(key, fan_in, fan_out):
    kw, kb = jax.random.split(key)
    bound = 1.0 / np.sqrt(fan_in)
    w = jax.random.uniform(kw, (fan_in, fan_out), jnp.float32, -bound, bound)
    b = jax.random.uniform(kb, (1, fan_out), jnp.float32, -bound, bound)
    return w, b


def init_mlp(key, dim, hidden, out_dim, layers):
    """mlp(dim, hidden, out, layers): Lin+act, layers x (Lin+act), Lin."""
    dims = [(dim, hidden, True)] + [(hidden, hidden, True)] * layers + [(hidden, out_dim, False)]
    params = []
    for (fi, fo, act) in dims:
        key, sub = jax.random.split(key)
        w, b = init_linear(sub, fi, fo)
        params.append((w, b, act))
    return params, key


# ---------------------------------------------------------------------------
# Pure-JAX reference (f32 everywhere) for the correctness check.
# ---------------------------------------------------------------------------
def _mlp_ref(h, params):
    for (w, b, act) in params:
        h = h @ w + b
        if act:
            h = jnp.maximum(h, 0.0)
    return h


def _forward_ref(x, z_c, y, backbone_p, lin_p, critic_p):
    n = x.shape[0]
    y_ohe = (y[:, 0][:, None].astype(jnp.int32)
             == jnp.arange(Y_OHE_DIM, dtype=jnp.int32)[None, :]).astype(jnp.float32)
    z_x = _mlp_ref(_mlp_ref(x, backbone_p), lin_p)
    xs = jnp.concatenate([z_x, y_ohe], axis=-1)
    ys = z_c
    t0 = _mlp_ref(jnp.concatenate([xs, ys], axis=-1), critic_p)                   # (N, 1)
    x_tile = jnp.broadcast_to(xs[None, :, :], (n, n, xs.shape[1]))
    y_tile = jnp.broadcast_to(ys[:, None, :], (n, n, ys.shape[1]))
    t1 = _mlp_ref(jnp.concatenate([x_tile, y_tile], axis=-1), critic_p)           # (N, N, 1)
    lse = jax.scipy.special.logsumexp(t1, axis=1)                                 # (N, 1)
    lower = jnp.mean(t0) - (jnp.mean(lse) - jnp.log(float(n)))
    return -lower


if __name__ == "__main__":
    key = jax.random.PRNGKey(0)

    # parameters
    backbone_p, key = init_mlp(key, X_DIM, HIDDEN_DIM, EMBED_DIM, LAYERS)
    lin_p, key = init_mlp(key, EMBED_DIM, EMBED_DIM, EMBED_DIM, 1)
    critic_p, key = init_mlp(key, EMBED_DIM + Y_OHE_DIM + C_EMBED_DIM,
                             CRITIC_HIDDEN, 1, CRITIC_LAYERS)

    # inputs
    kx, kz, ky = jax.random.split(key, 3)
    x = jax.random.normal(kx, (N, X_DIM), jnp.float32)
    z_c = jax.random.normal(kz, (N, C_EMBED_DIM), jnp.float32)
    y = jax.random.randint(ky, (N, 1), 0, Y_OHE_DIM, jnp.int32)

    score = concept_clsup_forward(x, z_c, y, backbone_p, lin_p, critic_p)
    score = jax.block_until_ready(score)

    ref = jax.block_until_ready(_forward_ref(x, z_c, y, backbone_p, lin_p, critic_p))
    # slack in atol/rtol because w2 and the all-pairs hidden activation h1 are
    # bf16 on the MXU (f32 accumulation) inside the kernel.
    assert np.allclose(np.asarray(score), np.asarray(ref), rtol=4e-3, atol=4e-3), (score, ref)

    print("KERNEL_OK")
</pallas_src>

<mosaic_0001>
module attributes {stable_mosaic.version = 11 : i64} {
  func.func @kernel(%arg0: memref<8x128xf32, #tpu.memory_space<vmem>>, %arg1: memref<232x128xf32, #tpu.memory_space<vmem>>, %arg2: memref<48x512xf32, #tpu.memory_space<vmem>>, %arg3: memref<512x512xbf16, #tpu.memory_space<vmem>>, %arg4: memref<1x1xf32, #tpu.memory_space<vmem>>) attributes {dimension_semantics = [], scalar_prefetch = 0 : i64, scratch_operands = 0 : i64, tpu.core_type = #tpu.core_type<tc>} {
    %c0 = arith.constant 0 : index
    %c0_0 = arith.constant 0 : index
    %0 = vector.load %arg0[%c0, %c0_0] : memref<8x128xf32, #tpu.memory_space<vmem>>, vector<8x128xf32>
    %1 = vector.extract_strided_slice %0 {offsets = [0, 32], sizes = [8, 16], strides = [1, 1]} : vector<8x128xf32> to vector<8x16xf32>
    %2 = vector.extract_strided_slice %0 {offsets = [0, 48], sizes = [8, 8], strides = [1, 1]} : vector<8x128xf32> to vector<8x8xf32>
    %3 = vector.extract_strided_slice %0 {offsets = [0, 0], sizes = [8, 32], strides = [1, 1]} : vector<8x128xf32> to vector<8x32xf32>
    %c0_1 = arith.constant 0 : index
    %c0_2 = arith.constant 0 : index
    %4 = vector.load %arg1[%c0_1, %c0_2] : memref<232x128xf32, #tpu.memory_space<vmem>>, vector<32x128xf32>
    %cst = arith.constant dense<0.000000e+00> : vector<8x128xf32>
    %5 = tpu.matmul %3, %4, %cst {dimension_numbers = #tpu.dot_dimension_numbers<[1], [0], [0], [1], [0, 0, 1, 1], [], []>} : vector<8x32xf32>, vector<32x128xf32>, vector<8x128xf32> -> vector<8x128xf32>
    %c32 = arith.constant 32 : index
    %c0_3 = arith.constant 0 : index
    %6 = vector.load %arg1[%c32, %c0_3] : memref<232x128xf32, #tpu.memory_space<vmem>>, vector<1x128xf32>
    %7 = vector.broadcast %6 : vector<1x128xf32> to vector<8x128xf32>
    %8 = arith.addf %5, %7 : vector<8x128xf32>
    %cst_4 = arith.constant 0.000000e+00 : f32
    %9 = vector.broadcast %cst_4 : f32 to vector<8x128xf32>
    %10 = arith.maximumf %8, %9 : vector<8x128xf32>
    %11 = vector.extract_strided_slice %10 {offsets = [0, 0], sizes = [8, 32], strides = [1, 1]} : vector<8x128xf32> to vector<8x32xf32>
    %c40 = arith.constant 40 : index
    %c0_5 = arith.constant 0 : index
    %12 = vector.load %arg1[%c40, %c0_5] : memref<232x128xf32, #tpu.memory_space<vmem>>, vector<32x128xf32>
    %cst_6 = arith.constant dense<0.000000e+00> : vector<8x128xf32>
    %13 = tpu.matmul %11, %12, %cst_6 {dimension_numbers = #tpu.dot_dimension_numbers<[1], [0], [0], [1], [0, 0, 1, 1], [], []>} : vector<8x32xf32>, vector<32x128xf32>, vector<8x128xf32> -> vector<8x128xf32>
    %c72 = arith.constant 72 : index
    %c0_7 = arith.constant 0 : index
    %14 = vector.load %arg1[%c72, %c0_7] : memref<232x128xf32, #tpu.memory_space<vmem>>, vector<1x128xf32>
    %15 = vector.broadcast %14 : vector<1x128xf32> to vector<8x128xf32>
    %16 = arith.addf %13, %15 : vector<8x128xf32>
    %cst_8 = arith.constant 0.000000e+00 : f32
    %17 = vector.broadcast %cst_8 : f32 to vector<8x128xf32>
    %18 = arith.maximumf %16, %17 : vector<8x128xf32>
    %19 = vector.extract_strided_slice %18 {offsets = [0, 0], sizes = [8, 32], strides = [1, 1]} : vector<8x128xf32> to vector<8x32xf32>
    %c80 = arith.constant 80 : index
    %c0_9 = arith.constant 0 : index
    %20 = vector.load %arg1[%c80, %c0_9] : memref<232x128xf32, #tpu.memory_space<vmem>>, vector<32x128xf32>
    %cst_10 = arith.constant dense<0.000000e+00> : vector<8x128xf32>
    %21 = tpu.matmul %19, %20, %cst_10 {dimension_numbers = #tpu.dot_dimension_numbers<[1], [0], [0], [1], [0, 0, 1, 1], [], []>} : vector<8x32xf32>, vector<32x128xf32>, vector<8x128xf32> -> vector<8x128xf32>
    %c112 = arith.constant 112 : index
    %c0_11 = arith.constant 0 : index
    %22 = vector.load %arg1[%c112, %c0_11] : memref<232x128xf32, #tpu.memory_space<vmem>>, vector<1x128xf32>
    %23 = vector.broadcast %22 : vector<1x128xf32> to vector<8x128xf32>
    %24 = arith.addf %21, %23 : vector<8x128xf32>
    %cst_12 = arith.constant 0.000000e+00 : f32
    %25 = vector.broadcast %cst_12 : f32 to vector<8x128xf32>
    %26 = arith.maximumf %24, %25 : vector<8x128xf32>
    %27 = vector.extract_strided_slice %26 {offsets = [0, 0], sizes = [8, 32], strides = [1, 1]} : vector<8x128xf32> to vector<8x32xf32>
    %c120 = arith.constant 120 : index
    %c0_13 = arith.constant 0 : index
    %28 = vector.load %arg1[%c120, %c0_13] : memref<232x128xf32, #tpu.memory_space<vmem>>, vector<32x128xf32>
    %cst_14 = arith.constant dense<0.000000e+00> : vector<8x128xf32>
    %29 = tpu.matmul %27, %28, %cst_14 {dimension_numbers = #tpu.dot_dimension_numbers<[1], [0], [0], [1], [0, 0, 1, 1], [], []>} : vector<8x32xf32>, vector<32x128xf32>, vector<8x128xf32> -> vector<8x128xf32>
    %c152 = arith.constant 152 : index
    %c0_15 = arith.constant 0 : index
    %30 = vector.load %arg1[%c152, %c0_15] : memref<232x128xf32, #tpu.memory_space<vmem>>, vector<1x128xf32>
    %31 = vector.broadcast %30 : vector<1x128xf32> to vector<8x128xf32>
    %32 = arith.addf %29, %31 : vector<8x128xf32>
    %33 = vector.extract_strided_slice %32 {offsets = [0, 0], sizes = [8, 16], strides = [1, 1]} : vector<8x128xf32> to vector<8x16xf32>
    %c160 = arith.constant 160 : index
    %c0_16 = arith.constant 0 : index
    %34 = vector.load %arg1[%c160, %c0_16] : memref<232x128xf32, #tpu.memory_space<vmem>>, vector<16x128xf32>
    %cst_17 = arith.constant dense<0.000000e+00> : vector<8x128xf32>
    %35 = tpu.matmul %33, %34, %cst_17 {dimension_numbers = #tpu.dot_dimension_numbers<[1], [0], [0], [1], [0, 0, 1, 1], [], []>} : vector<8x16xf32>, vector<16x128xf32>, vector<8x128xf32> -> vector<8x128xf32>
    %c176 = arith.constant 176 : index
    %c0_18 = arith.constant 0 : index
    %36 = vector.load %arg1[%c176, %c0_18] : memref<232x128xf32, #tpu.memory_space<vmem>>, vector<1x128xf32>
    %37 = vector.broadcast %36 : vector<1x128xf32> to vector<8x128xf32>
    %38 = arith.addf %35, %37 : vector<8x128xf32>
    %cst_19 = arith.constant 0.000000e+00 : f32
    %39 = vector.broadcast %cst_19 : f32 to vector<8x128xf32>
    %40 = arith.maximumf %38, %39 : vector<8x128xf32>
    %41 = vector.extract_strided_slice %40 {offsets = [0, 0], sizes = [8, 16], strides = [1, 1]} : vector<8x128xf32> to vector<8x16xf32>
    %c184 = arith.constant 184 : index
    %c0_20 = arith.constant 0 : index
    %42 = vector.load %arg1[%c184, %c0_20] : memref<232x128xf32, #tpu.memory_space<vmem>>, vector<16x128xf32>
    %cst_21 = arith.constant dense<0.000000e+00> : vector<8x128xf32>
    %43 = tpu.matmul %41, %42, %cst_21 {dimension_numbers = #tpu.dot_dimension_numbers<[1], [0], [0], [1], [0, 0, 1, 1], [], []>} : vector<8x16xf32>, vector<16x128xf32>, vector<8x128xf32> -> vector<8x128xf32>
    %c200 = arith.constant 200 : index
    %c0_22 = arith.constant 0 : index
    %44 = vector.load %arg1[%c200, %c0_22] : memref<232x128xf32, #tpu.memory_space<vmem>>, vector<1x128xf32>
    %45 = vector.broadcast %44 : vector<1x128xf32> to vector<8x128xf32>
    %46 = arith.addf %43, %45 : vector<8x128xf32>
    %cst_23 = arith.constant 0.000000e+00 : f32
    %47 = vector.broadcast %cst_23 : f32 to vector<8x128xf32>
    %48 = arith.maximumf %46, %47 : vector<8x128xf32>
    %49 = vector.extract_strided_slice %48 {offsets = [0, 0], sizes = [8, 16], strides = [1, 1]} : vector<8x128xf32> to vector<8x16xf32>
    %c208 = arith.constant 208 : index
    %c0_24 = arith.constant 0 : index
    %50 = vector.load %arg1[%c208, %c0_24] : memref<232x128xf32, #tpu.memory_space<vmem>>, vector<16x128xf32>
    %cst_25 = arith.constant dense<0.000000e+00> : vector<8x128xf32>
    %51 = tpu.matmul %49, %50, %cst_25 {dimension_numbers = #tpu.dot_dimension_numbers<[1], [0], [0], [1], [0, 0, 1, 1], [], []>} : vector<8x16xf32>, vector<16x128xf32>, vector<8x128xf32> -> vector<8x128xf32>
    %c224 = arith.constant 224 : index
    %c0_26 = arith.constant 0 : index
    %52 = vector.load %arg1[%c224, %c0_26] : memref<232x128xf32, #tpu.memory_space<vmem>>, vector<1x128xf32>
    %53 = vector.broadcast %52 : vector<1x128xf32> to vector<8x128xf32>
    %54 = arith.addf %51, %53 : vector<8x128xf32>
    %55 = vector.extract_strided_slice %54 {offsets = [0, 0], sizes = [8, 16], strides = [1, 1]} : vector<8x128xf32> to vector<8x16xf32>
    %c0_27 = arith.constant 0 : index
    %c0_28 = arith.constant 0 : index
    %56 = vector.load %arg2[%c0_27, %c0_28] : memref<48x512xf32, #tpu.memory_space<vmem>>, vector<16x512xf32>
    %c16 = arith.constant 16 : index
    %c0_29 = arith.constant 0 : index
    %57 = vector.load %arg2[%c16, %c0_29] : memref<48x512xf32, #tpu.memory_space<vmem>>, vector<8x512xf32>
    %c24 = arith.constant 24 : index
    %c0_30 = arith.constant 0 : index
    %58 = vector.load %arg2[%c24, %c0_30] : memref<48x512xf32, #tpu.memory_space<vmem>>, vector<16x512xf32>
    %c40_31 = arith.constant 40 : index
    %c0_32 = arith.constant 0 : index
    %59 = vector.load %arg2[%c40_31, %c0_32] : memref<48x512xf32, #tpu.memory_space<vmem>>, vector<1x512xf32>
    %c41 = arith.constant 41 : index
    %c0_33 = arith.constant 0 : index
    %60 = vector.load %arg2[%c41, %c0_33] : memref<48x512xf32, #tpu.memory_space<vmem>>, vector<1x512xf32>
    %c42 = arith.constant 42 : index
    %c0_34 = arith.constant 0 : index
    %61 = vector.load %arg2[%c42, %c0_34] : memref<48x512xf32, #tpu.memory_space<vmem>>, vector<1x512xf32>
    %c43 = arith.constant 43 : index
    %c0_35 = arith.constant 0 : index
    %62 = vector.load %arg2[%c43, %c0_35] : memref<48x512xf32, #tpu.memory_space<vmem>>, vector<1x1xf32>
    %cst_36 = arith.constant dense<0.000000e+00> : vector<8x512xf32>
    %63 = tpu.matmul %55, %56, %cst_36 {dimension_numbers = #tpu.dot_dimension_numbers<[1], [0], [0], [1], [0, 0, 1, 1], [], []>} : vector<8x16xf32>, vector<16x512xf32>, vector<8x512xf32> -> vector<8x512xf32>
    %cst_37 = arith.constant dense<0.000000e+00> : vector<8x512xf32>
    %64 = tpu.matmul %2, %57, %cst_37 {dimension_numbers = #tpu.dot_dimension_numbers<[1], [0], [0], [1], [0, 0, 1, 1], [], []>} : vector<8x8xf32>, vector<8x512xf32>, vector<8x512xf32> -> vector<8x512xf32>
    %65 = arith.addf %63, %64 : vector<8x512xf32>
    %66 = vector.broadcast %59 : vector<1x512xf32> to vector<8x512xf32>
    %67 = arith.addf %65, %66 : vector<8x512xf32>
    %cst_38 = arith.constant dense<0.000000e+00> : vector<8x512xf32>
    %68 = tpu.matmul %1, %58, %cst_38 {dimension_numbers = #tpu.dot_dimension_numbers<[1], [0], [0], [1], [0, 0, 1, 1], [], []>} : vector<8x16xf32>, vector<16x512xf32>, vector<8x512xf32> -> vector<8x512xf32>
    %69 = vector.shape_cast %67 : vector<8x512xf32> to vector<1x8x512xf32>
    %70 = vector.shape_cast %68 : vector<8x512xf32> to vector<8x1x512xf32>
    %71 = vector.broadcast %69 : vector<1x8x512xf32> to vector<8x8x512xf32>
    %72 = vector.broadcast %70 : vector<8x1x512xf32> to vector<8x8x512xf32>
    %73 = arith.addf %71, %72 : vector<8x8x512xf32>
    %74 = vector.shape_cast %73 : vector<8x8x512xf32> to vector<64x512xf32>
    %cst_39 = arith.constant 0.000000e+00 : f32
    %75 = vector.broadcast %cst_39 : f32 to vector<64x512xf32>
    %76 = arith.maximumf %74, %75 : vector<64x512xf32>
    %77 = arith.truncf %76 : vector<64x512xf32> to vector<64x512xbf16>
    %c0_40 = arith.constant 0 : index
    %c0_41 = arith.constant 0 : index
    %78 = vector.load %arg3[%c0_40, %c0_41] : memref<512x512xbf16, #tpu.memory_space<vmem>>, vector<512x512xbf16>
    %cst_42 = arith.constant dense<0.000000e+00> : vector<64x512xf32>
    %79 = tpu.matmul %77, %78, %cst_42 {dimension_numbers = #tpu.dot_dimension_numbers<[1], [0], [0], [1], [0, 0, 1, 1], [], []>} : vector<64x512xbf16>, vector<512x512xbf16>, vector<64x512xf32> -> vector<64x512xf32>
    %80 = vector.broadcast %60 : vector<1x512xf32> to vector<64x512xf32>
    %81 = arith.addf %79, %80 : vector<64x512xf32>
    %cst_43 = arith.constant 0.000000e+00 : f32
    %82 = vector.broadcast %cst_43 : f32 to vector<64x512xf32>
    %83 = arith.maximumf %81, %82 : vector<64x512xf32>
    %84 = vector.broadcast %61 : vector<1x512xf32> to vector<64x512xf32>
    %85 = arith.mulf %83, %84 : vector<64x512xf32>
    %86 = vector.shape_cast %85 : vector<64x512xf32> to vector<8x8x512xf32>
    %cst_44 = arith.constant dense<0.000000e+00> : vector<8x8xf32>
    %87 = vector.multi_reduction <add>, %86, %cst_44 [2] : vector<8x8x512xf32> to vector<8x8xf32>
    %88 = vector.broadcast %62 : vector<1x1xf32> to vector<8x8xf32>
    %89 = arith.addf %87, %88 : vector<8x8xf32>
    %90 = tpu.iota {dimensions = array<i32: 0>} : vector<8x8xi32>
    %91 = tpu.iota {dimensions = array<i32: 1>} : vector<8x8xi32>
    %92 = arith.cmpi eq, %90, %91 : vector<8x8xi32>
    %cst_45 = arith.constant 0.000000e+00 : f32
    %93 = vector.broadcast %cst_45 : f32 to vector<8x8xf32>
    %94 = arith.select %92, %89, %93 : vector<8x8xi1>, vector<8x8xf32>
    %cst_46 = arith.constant dense<0.000000e+00> : vector<8xf32>
    %95 = vector.multi_reduction <add>, %94, %cst_46 [1] : vector<8x8xf32> to vector<8xf32>
    %96 = vector.shape_cast %95 : vector<8xf32> to vector<8x1xf32>
    %cst_47 = arith.constant dense<0.000000e+00> : vector<1xf32>
    %97 = vector.multi_reduction <add>, %96, %cst_47 [0] : vector<8x1xf32> to vector<1xf32>
    %98 = vector.shape_cast %97 : vector<1xf32> to vector<1x1xf32>
    %cst_48 = arith.constant 1.250000e-01 : f32
    %99 = vector.broadcast %cst_48 : f32 to vector<1x1xf32>
    %100 = arith.mulf %98, %99 : vector<1x1xf32>
    %cst_49 = arith.constant dense<0xFF800000> : vector<8xf32>
    %101 = vector.multi_reduction <maximumf>, %89, %cst_49 [1] : vector<8x8xf32> to vector<8xf32>
    %102 = vector.shape_cast %101 : vector<8xf32> to vector<8x1xf32>
    %103 = vector.broadcast %102 : vector<8x1xf32> to vector<8x8xf32>
    %104 = arith.subf %89, %103 : vector<8x8xf32>
    %105 = math.exp %104 : vector<8x8xf32>
    %cst_50 = arith.constant dense<0.000000e+00> : vector<8xf32>
    %106 = vector.multi_reduction <add>, %105, %cst_50 [1] : vector<8x8xf32> to vector<8xf32>
    %107 = vector.shape_cast %106 : vector<8xf32> to vector<8x1xf32>
    %108 = math.log %107 : vector<8x1xf32>
    %109 = arith.addf %102, %108 : vector<8x1xf32>
    %cst_51 = arith.constant dense<0.000000e+00> : vector<1xf32>
    %110 = vector.multi_reduction <add>, %109, %cst_51 [0] : vector<8x1xf32> to vector<1xf32>
    %111 = vector.shape_cast %110 : vector<1xf32> to vector<1x1xf32>
    %cst_52 = arith.constant 1.250000e-01 : f32
    %112 = vector.broadcast %cst_52 : f32 to vector<1x1xf32>
    %113 = arith.mulf %111, %112 : vector<1x1xf32>
    %cst_53 = arith.constant 2.07944155 : f32
    %114 = vector.broadcast %cst_53 : f32 to vector<1x1xf32>
    %115 = arith.subf %113, %114 : vector<1x1xf32>
    %116 = arith.subf %100, %115 : vector<1x1xf32>
    %cst_54 = arith.constant 0.000000e+00 : f32
    %117 = vector.broadcast %cst_54 : f32 to vector<1x1xf32>
    %118 = arith.subf %117, %116 : vector<1x1xf32>
    %c0_55 = arith.constant 0 : index
    %c0_56 = arith.constant 0 : index
    %119 = vector.load %arg4[%c0_55, %c0_56] : memref<1x1xf32, #tpu.memory_space<vmem>>, vector<1x1xf32>
    tpu.vector_store %arg4[%c0_55, %c0_56], %118 {strides = array<i32>} : memref<1x1xf32, #tpu.memory_space<vmem>>, vector<1x1xf32>,
    return
  }
}

</mosaic_0001>

<bundles_post_ra>
// kernel: tpu_custom_call.1
= control target key start
LH: loop header
LB: loop body
LE: loop exit
PB: predicated region body
PF: predicated region fallthrough
CT: control target
= control target key end

     0   :  { %9 = vsyncpa [#allocation3], 0  ;;  %s3685_s0 = inlined_call_operand.hbm [shape: f32[8,128], index: 0, kind: input, shape index: {}]   ;;  %s3686_s1 = inlined_call_operand.hbm [shape: f32[232,128], index: 1, kind: input, shape index: {}]   ;;  %s3687_s2 = inlined_call_operand.hbm [shape: f32[48,512], index: 2, kind: input, shape index: {}]   ;;  %s3688_s3 = inlined_call_operand.hbm [shape: bf16[512,512], index: 3, kind: input, shape index: {}]   ;;  %s3689_s4 = inlined_call_operand.hbm [shape: f32[1,1], index: 4, kind: output, shape index: {}]  }
   0x1   :  { %10 = vsyncpa [#allocation6], 0 }
   0x2   :  { %11 = vsyncpa [#allocation9], 0  ;;  %s28_s17 = sshll.u32 %s3686_s1, 4  ;;  %s29_s17 = int_to_ptr.hbm [resolvable:$true] %s28_s17 }
   0x3   :  { %12 = vsyncpa [#allocation4], 0  ;;  %s3141_s18 = smov [#allocation5]   ;;  %s18_s22 = sshll.u32 %s3685_s0, 4  ;;  %s19_s22 = int_to_ptr.hbm [resolvable:$true] %s18_s22 }
   0x4   :  { %s30_s19 = sshll.u32 %s3141_s18, 4  ;;  %s3142_s23 = smov 128   ;;  %s31_s19 = int_to_ptr.vmem [resolvable:$true] %s30_s19 }
   0x5   :  { %s3143_s24 = smov 8   ;;  %s3144_s25 = smov [#allocation2]  }
   0x6   :  { %36 = dma.hbm_to_vmem [thread:$0]  %s29_s17, 3712, %s31_s19, [#allocation6], %s3142_s23, %s3142_s23, %s3143_s24  }
   0x7   :  { %s20_s26 = sshll.u32 %s3144_s25, 4  ;;  %s41_s29 = sshll.u32 %s3687_s2, 4  ;;  %s21_s26 = int_to_ptr.vmem [resolvable:$true] %s20_s26  ;;  %s42_s29 = int_to_ptr.hbm [resolvable:$true] %s41_s29 }
   0x8   :  { %23 = dma.hbm_to_vmem [thread:$0]  %s19_s22, 128, %s21_s26, [#allocation3]  }
   0x9   :  { %s3145_s1 = smov [#allocation7]   ;;  %s54_s0 = sshll.u32 %s3688_s3, 4  ;;  %s55_s0 = int_to_ptr.hbm [resolvable:$true] %s54_s0 }
   0xa   :  { %s43_s30 = sshll.u32 %s3145_s1, 4  ;;  %s3146_s7 = smov 512   ;;  %s44_s30 = int_to_ptr.vmem [resolvable:$true] %s43_s30 }
   0xb   :  { %s3147_s8 = smov 32   ;;  %s3148_s9 = smov [#allocation8]  }
   0xc   :  { %49 = dma.hbm_to_vmem [thread:$0]  %s42_s29, 3072, %s44_s30, [#allocation6], %s3146_s7, %s3146_s7, %s3147_s8  }
   0xd   :  { %s56_s10 = sshll.u32 %s3148_s9, 4  ;;  %s3149_s11 = smov 256   ;;  %s57_s10 = int_to_ptr.vmem [resolvable:$true] %s56_s10 }
   0xe   :  { %s3150_s12 = smov 16  }
   0xf   :  { %62 = dma.hbm_to_vmem [thread:$0]  %s55_s0, 16384, %s57_s10, [#allocation9], %s3149_s11, %s3149_s11, %s3150_s12  }
  0x10   :  { %3133 = dma.done.wait [#allocation3], 128  }
  0x11   :  { %3134 = vsyncadd [#allocation3], 4294967168 }
  0x12   :  { %3135 = dma.done.wait [#allocation6], 6784  }
  0x13   :  { %3136 = vsyncadd [#allocation6], 4294960512 }
  0x14   :  { %3137 = dma.done.wait [#allocation9], 16384  }
  0x15   :  { %3138 = vsyncadd [#allocation9], 4294950912  ;;  %v83_v0 = vld [vmem:[#allocation5 + $0x18] sm:$0xff]  ;;  %v82_v1 = vld [vmem:[#allocation5 + $0x10] sm:$0xff]  ;;  %vm86_vm0 = vcmask 261120   ;;  %vm204_vm1 = vcmask 130048  }
  0x16   :  { %102 = vmatpush.msra.mxu0 %v83_v0  ;;  %v114_v2 = vld [vmem:[#allocation5 + $0x40] sm:$0xff]  ;;  %v81_v3 = vld [vmem:[#allocation5 + $0x8] sm:$0xff]  ;;  %v3192_v5 = vld [vmem:[#allocation2] sm:$0xff]  ;;  %s3151_s2 = smov 80   ;;  %s3152_s3 = smov 96   ;;  %vm313_vm2 = vcmask 64512  }
  0x17   :  { %132 = vmatpush.msra.mxu1 %v114_v2  ;;  %v80_v4 = vld [vmem:[#allocation5] sm:$0xff]  ;;  %v113_v6 = vld [vmem:[#allocation5 + $0x38] sm:$0xff]  ;;  %v112_v7 = vld [vmem:[#allocation5 + $0x30] sm:$0xff]  ;;  %311 = vrot.lane.b32.xlu0 %v3192_v5, %s3151_s2  ;;  %vm583_vm3 = vcmask 1040384   ;;  %vm585_vm4 = vcmask 1042434   ;;  %vm587_vm5 = vcmask 1041408  }
  0x18   :  { %103 = vmatpush.msra.mxu0 %v82_v1  ;;  %v111_v8 = vld [vmem:[#allocation5 + $0x28] sm:$0xff]  ;;  %v2988_v10 = vld [vmem:[#allocation5 + $0x20] ss:$0 sm:$0xff]  ;;  %v142_v15 = vld [vmem:[#allocation5 + $0x58] sm:$0xff]  ;;  %vm589_vm6 = vcmask 1041409   ;;  %vm591_vm7 = vcmask 1043459  }
  0x19   :  { %133 = vmatpush.msra.mxu1 %v113_v6  ;;  %v144_v9 = vld [vmem:[#allocation5 + $0x68] sm:$0xff]  ;;  %v143_v14 = vld [vmem:[#allocation5 + $0x60] sm:$0xff]  ;;  %v141_v16 = vld [vmem:[#allocation5 + $0x50] sm:$0xff]  ;;  %vm593_vm8 = vcmask 1042433   ;;  %vm597_vm9 = vcmask 1044484   ;;  %vm599_vm10 = vcmask 1043458  }
  0x1a   :  { %104 = vmatpush.msra.mxu0 %v81_v3  ;;  %162 = vmatpush.msra.mxu2 %v144_v9  ;;  %v174_v17 = vld [vmem:[#allocation5 + $0x90] sm:$0xff]  ;;  %v2989_v18 = vld [vmem:[#allocation5 + $0x48] ss:$0 sm:$0xff]  ;;  %v172_v23 = vld [vmem:[#allocation5 + $0x80] sm:$0xff]  ;;  %vm603_vm11 = vcmask 1045509   ;;  %vm605_vm12 = vcmask 1044483  }
  0x1b   :  { %134 = vmatpush.msra.mxu1 %v112_v7  ;;  %192 = vmatpush.msra.mxu3 %v174_v17  ;;  %v173_v22 = vld [vmem:[#allocation5 + $0x88] sm:$0xff]  ;;  %v171_v24 = vld [vmem:[#allocation5 + $0x78] sm:$0xff]  ;;  %v200_v26 = vld [vmem:[#allocation5 + $0xa0] sm:$0xff]  ;;  %vm611_vm13 = vcmask 1045508   ;;  %vm609_vm14 = vcmask 1046534   ;;  %vm617_vm15 = vcmask 1046533  }
  0x1c   :  { %105 = vmatpush.msra.mxu0 %v80_v4  ;;  %163 = vmatpush.msra.mxu2 %v143_v14  ;;  %v201_v25 = vld [vmem:[#allocation5 + $0xa8] sm:$0xff]  ;;  %v2990_v27 = vld [vmem:[#allocation5 + $0x70] ss:$0 sm:$0xff]  ;;  %v230_v31 = vld [vmem:[#allocation5 + $0xc0] sm:$0xff]  ;;  %s3154_s13 = smov [#allocation10]   ;;  %s2299_s17 = sshll.u32 %s3689_s4, 4  ;;  %s2300_s17 = int_to_ptr.hbm [resolvable:$true] %s2299_s17 }
  0x1d   :  { %2311 = vmatmul.msk.f32.vlgmr.msra.gmra.mxu0 %vm86_vm0, %v3192_v5  ;;  %135 = vmatpush.msra.mxu1 %v111_v8  ;;  %v2991_v32 = vld [vmem:[#allocation5 + $0x98] ss:$0 sm:$0xff]  ;;  %v2992_v37 = vld [vmem:[#allocation5 + $0xb0] ss:$0 sm:$0xff]  ;;  %v295_v42 = vld [vmem:[#allocation7 + $0x58] sm:$0xff]  ;;  %s2297_s14 = sshll.u32 %s3154_s13, 4  ;;  %s2298_s14 = int_to_ptr.vmem [resolvable:$true] %s2297_s14 }
  0x1e   :  { %164 = vmatpush.msra.mxu2 %v142_v15  ;;  %193 = vmatpush.msra.mxu3 %v173_v22  ;;  %v229_v35 = vld [vmem:[#allocation5 + $0xb8] sm:$0xff]  ;;  %v257_v41 = vld [vmem:[#allocation5 + $0xd0] sm:$0xff]  ;;  %v292_v43 = vld [vmem:[#allocation7 + $0x40] sm:$0xff] }
  0x1f   :  { %222 = vmatpush.msrb.mxu0 %v201_v25  ;;  %250 = vmatpush.msrb.mxu1 %v230_v31  ;;  %v258_v36 = vld [vmem:[#allocation5 + $0xd8] sm:$0xff]  ;;  %v293_v44 = vld [vmem:[#allocation7 + $0x48] sm:$0xff]  ;;  %v288_v46 = vld [vmem:[#allocation7 + $0x20] sm:$0xff] }
  0x20   :  { %165 = vmatpush.msra.mxu2 %v141_v16  ;;  %194 = vmatpush.msra.mxu3 %v172_v23  ;;  %v294_v45 = vld [vmem:[#allocation7 + $0x50] sm:$0xff]  ;;  %v2993_v48 = vld [vmem:[#allocation5 + $0xc8] ss:$0 sm:$0xff]  ;;  %v291_v52 = vld [vmem:[#allocation7 + $0x38] sm:$0xff] }
  0x21   :  { %223 = vmatpush.msrb.mxu0 %v200_v26  ;;  %251 = vmatpush.msrb.mxu1 %v229_v35  ;;  %v287_v53 = vld [vmem:[#allocation7 + $0x18] sm:$0xff]  ;;  %v289_v54 = vld [vmem:[#allocation7 + $0x28] sm:$0xff]  ;;  %v290_v55 = vld [vmem:[#allocation7 + $0x30] sm:$0xff] }
  0x22   :  { %195 = vmatpush.msra.mxu3 %v171_v24  ;;  %278 = vmatpush.msrb.mxu2 %v258_v36  ;;  %v284_v56 = vld [vmem:[#allocation7] sm:$0xff]  ;;  %v285_v57 = vld [vmem:[#allocation7 + $0x8] sm:$0xff]  ;;  %v286_v58 = vld [vmem:[#allocation7 + $0x10] sm:$0xff] }
  0x23   :  { %492 = vrot.lane.b32.xlu0 %v3192_v5, %s3152_s3  ;;  %351 = vmatpush.msra.mxu0 %v293_v44  ;;  %v303_v59 = vld [vmem:[#allocation7 + $0x98] sm:$0xff]  ;;  %v300_v60 = vld [vmem:[#allocation7 + $0x80] sm:$0xff]  ;;  %v301_v62 = vld [vmem:[#allocation7 + $0x88] sm:$0xff] }
  0x24   :  { %279 = vmatpush.msrb.mxu2 %v257_v41  ;;  %331 = vmatpush.msrb.mxu3 %v292_v43  ;;  %v299_v61 = vld [vmem:[#allocation7 + $0x78] sm:$0xff]  ;;  %v302_v63 = vld [vmem:[#allocation7 + $0x90] sm:$0xff]  ;;  %v296_v0 = vld [vmem:[#allocation7 + $0x60] sm:$0xff] }
  0x25   :  { %v297_v1 = vld [vmem:[#allocation7 + $0x68] sm:$0xff]  ;;  %v298_v2 = vld [vmem:[#allocation7 + $0x70] sm:$0xff]  ;;  %v2994_v3 = vld [vmem:[#allocation5 + $0xe0] ss:$0 sm:$0xff] }
  0x26   :  { %v2444_v4 = vld [vmem:[#allocation8 + $0xe0] sm:$0xf]  ;;  %v2873_v5 = vld [vmem:[#allocation8 + $0xec] sm:$0xf0] }
  0x27   :  { %v2572_v6 = vld [vmem:[#allocation8 + $0x1e0] sm:$0xf]  ;;  %v2905_v7 = vld [vmem:[#allocation8 + $0x1ec] sm:$0xf0]  ;;  %v2445_v14 = vor.u32 %v2873_v5, %v2444_v4 }
  0x28   :  { %v2700_v8 = vld [vmem:[#allocation8 + $0x2e0] sm:$0xf]  ;;  %v2937_v9 = vld [vmem:[#allocation8 + $0x2ec] sm:$0xf0]  ;;  %v2573_v15 = vor.u32 %v2905_v7, %v2572_v6 }
  0x29   :  { %v2701_v16 = vor.u32 %v2937_v9, %v2700_v8  ;;  %v2901_v23 = vld [vmem:[#allocation8 + $0x1cc] sm:$0xf0]  ;;  %v2684_v24 = vld [vmem:[#allocation8 + $0x2c0] sm:$0xf] }
  0x2a   :  { %v2933_v26 = vld [vmem:[#allocation8 + $0x2cc] sm:$0xf0]  ;;  %v2412_v31 = vld [vmem:[#allocation8 + $0xa0] sm:$0xf] }
  0x2b   :  { %v2897_v35 = vld [vmem:[#allocation8 + $0x1ac] sm:$0xf0]  ;;  %v2668_v36 = vld [vmem:[#allocation8 + $0x2a0] sm:$0xf] }
  0x2c   :  { %v2961_v41 = vld [vmem:[#allocation8 + $0x3ac] sm:$0xf0]  ;;  %v2396_v43 = vld [vmem:[#allocation8 + $0x80] sm:$0xf] }
  0x2d   :  { %v2861_v44 = vld [vmem:[#allocation8 + $0x8c] sm:$0xf0]  ;;  %v2492_v5 = vld [vmem:[#allocation8 + $0x140] sm:$0xf] }
  0x2e   :  { %v2853_v4 = vld [vmem:[#allocation8 + $0x4c] sm:$0xf0]  ;;  %v2620_v8 = vld [vmem:[#allocation8 + $0x240] sm:$0xf] }
  0x2f   :  { %v2885_v7 = vld [vmem:[#allocation8 + $0x14c] sm:$0xf0] }
  0x30   :  { %v2917_v9 = vld [vmem:[#allocation8 + $0x24c] sm:$0xf0] }
  0x89   :  { %v312_v47 = vpop.permute.xlu0 %311 }
  0x9a   :  { %v107_v11 = vpop.f32.mrf.mxu0 }
  0x9b   :  { %v108_v12 = vadd.f32 %v2988_v10, %v107_v11  ;;  %v2828_v10 = vld [vmem:[#allocation8 + $0x3e0] sm:$0xf]  ;;  %v2969_v11 = vld [vmem:[#allocation8 + $0x3ec] sm:$0xf0] }
  0x9c   :  { %v2829_v17 = vor.u32 %v2969_v11, %v2828_v10  ;;  %v2493_v10 = vor.u32 %v2885_v7, %v2492_v5  ;;  %v2621_v11 = vor.u32 %v2917_v9, %v2620_v8 }
  0x9d   :  { %v110_v13 = vmax.f32 %v108_v12, 0.0 }
  0x9f   :  { %2312 = vmatmul.msk.f32.vlgmr.msra.gmra.mxu1 %vm86_vm0, %v110_v13 }
  0xa0   :  { %371 = vmatpush.msra.mxu1 %v294_v45  ;;  %v2397_v45 = vor.u32 %v2861_v44, %v2396_v43  ;;  %v2871_v43 = vld [vmem:[#allocation8 + $0xe4] sm:$0xf]  ;;  %v2446_v44 = vld [vmem:[#allocation8 + $0xf0] sm:$0xf0] }
 0x11c   :  { %v137_v19 = vpop.f32.mrf.mxu1 }
 0x11d   :  { %v138_v20 = vadd.f32 %v2989_v18, %v137_v19  ;;  %v493_v18 = vpop.permute.xlu0 %492  ;;  %v2428_v19 = vld [vmem:[#allocation8 + $0xc0] sm:$0xf] }
 0x11f   :  { %v140_v21 = vmax.f32 %v138_v20, 0.0  ;;  %v2869_v20 = vld [vmem:[#allocation8 + $0xcc] sm:$0xf0] }
 0x120   :  { %v2429_v22 = vor.u32 %v2869_v20, %v2428_v19 }
 0x121   :  { %2313 = vmatmul.msk.f32.vlgmr.msra.gmra.mxu2 %vm86_vm0, %v140_v21  ;;  %v2556_v21 = vld [vmem:[#allocation8 + $0x1c0] sm:$0xf] }
 0x122   :  { %391 = vmatpush.msra.mxu2 %v295_v42  ;;  %v2557_v25 = vor.u32 %v2901_v23, %v2556_v21  ;;  %v2604_v21 = vld [vmem:[#allocation8 + $0x220] sm:$0xf] }
 0x123   :  { %v2732_v23 = vld [vmem:[#allocation8 + $0x320] sm:$0xf] }
 0x1a4   :  { %v167_v28 = vpop.f32.mrf.mxu2 }
 0x1a5   :  { %v168_v29 = vadd.f32 %v2990_v27, %v167_v28  ;;  %v2812_v27 = vld [vmem:[#allocation8 + $0x3c0] sm:$0xf]  ;;  %v2685_v28 = vor.u32 %v2933_v26, %v2684_v24 }
 0x1a6   :  { %v2332_v26 = vld [vmem:[#allocation8] sm:$0xf] }
 0x1a7   :  { %v170_v30 = vmax.f32 %v168_v29, 0.0  ;;  %v2965_v29 = vld [vmem:[#allocation8 + $0x3cc] sm:$0xf0] }
 0x1a9   :  { %2314 = vmatmul.msk.f32.vlgmr.msra.gmra.mxu3 %vm86_vm0, %v170_v30  ;;  %v2813_v30 = vor.u32 %v2965_v29, %v2812_v27  ;;  %v2845_v27 = vld [vmem:[#allocation8 + $0xc] sm:$0xf0]  ;;  %v2460_v29 = vld [vmem:[#allocation8 + $0x100] sm:$0xf]  ;;  %vm615_vm0 = vcmask 1046528  }
 0x1aa   :  { %413 = vmatpush.msra.mxu3 %v288_v46  ;;  %v2524_v46 = vld [vmem:[#allocation8 + $0x180] sm:$0xf] }
 0x1ac   :  { %414 = vmatpush.msra.mxu3 %v284_v56  ;;  %v2857_v56 = vld [vmem:[#allocation8 + $0x6c] sm:$0xf0] }
 0x1b1   :  { %2318 = vmatmul.msk.f32.vlgmr.msrb.gmra.mxu3 %vm313_vm2, %v312_v47 }
 0x1b2   :  { %510 = vmatpush.msrb.mxu3 %v300_v60  ;;  %v2636_v60 = vld [vmem:[#allocation8 + $0x260] sm:$0xf] }
 0x1b4   :  { %511 = vmatpush.msrb.mxu3 %v296_v0  ;;  %v2764_v0 = vld [vmem:[#allocation8 + $0x360] sm:$0xf] }
 0x22c   :  { %v197_v33 = vpop.f32.mrf.mxu3 }
 0x22d   :  { %v198_v34 = vadd.f32 %v2991_v32, %v197_v33  ;;  %v2865_v32 = vld [vmem:[#allocation8 + $0xac] sm:$0xf0]  ;;  %v2540_v33 = vld [vmem:[#allocation8 + $0x1a0] sm:$0xf] }
 0x22f   :  { %2315 = vmatmul.msk.f32.vlgmr.msrb.gmra.mxu0 %vm204_vm1, %v198_v34  ;;  %v2413_v34 = vor.u32 %v2865_v32, %v2412_v31  ;;  %v2588_v31 = vld [vmem:[#allocation8 + $0x200] sm:$0xf] }
 0x230   :  { %433 = vmatpush.msrb.mxu0 %v289_v54 }
 0x232   :  { %434 = vmatpush.msrb.mxu0 %v285_v57  ;;  %v2508_v57 = vld [vmem:[#allocation8 + $0x160] sm:$0xf] }
 0x237   :  { %2319 = vmatmul.msk.f32.vlgmr.msra.gmra.mxu0 %vm313_vm2, %v312_v47 }
 0x238   :  { %530 = vmatpush.msra.mxu0 %v301_v62 }
 0x23a   :  { %531 = vmatpush.msra.mxu0 %v297_v1  ;;  %v2953_v1 = vld [vmem:[#allocation8 + $0x36c] sm:$0xf0] }
 0x2ac   :  { %v225_v38 = vpop.f32.mrf.mxu0 }
 0x2ad   :  { %v226_v39 = vadd.f32 %v2992_v37, %v225_v38  ;;  %v2929_v37 = vld [vmem:[#allocation8 + $0x2ac] sm:$0xf0]  ;;  %v2541_v38 = vor.u32 %v2897_v35, %v2540_v33  ;;  %v2333_v33 = vor.u32 %v2845_v27, %v2332_v26  ;;  %v2716_v35 = vld [vmem:[#allocation8 + $0x300] sm:$0xf] }
 0x2af   :  { %v228_v40 = vmax.f32 %v226_v39, 0.0  ;;  %v2669_v39 = vor.u32 %v2929_v37, %v2668_v36  ;;  %v2941_v36 = vld [vmem:[#allocation8 + $0x30c] sm:$0xf0] }
 0x2b1   :  { %2316 = vmatmul.msk.f32.vlgmr.msrb.gmra.mxu1 %vm204_vm1, %v228_v40  ;;  %v2796_v40 = vld [vmem:[#allocation8 + $0x3a0] sm:$0xf] }
 0x2b2   :  { %453 = vmatpush.msrb.mxu1 %v290_v55  ;;  %v2797_v42 = vor.u32 %v2961_v41, %v2796_v40  ;;  %v2380_v55 = vld [vmem:[#allocation8 + $0x60] sm:$0xf]  ;;  %v2717_v40 = vor.u32 %v2941_v36, %v2716_v35  ;;  %v333_v41 = vpop.f32.mrf.mxu3 }
 0x2b4   :  { %454 = vmatpush.msrb.mxu1 %v286_v58  ;;  %v2381_v58 = vor.u32 %v2857_v56, %v2380_v55  ;;  %v353_v32 = vpop.f32.mrf.mxu0 }
 0x2b9   :  { %2320 = vmatmul.msk.f32.vlgmr.msra.gmra.mxu1 %vm313_vm2, %v312_v47 }
 0x2ba   :  { %550 = vmatpush.msra.mxu1 %v302_v63 }
 0x2bc   :  { %551 = vmatpush.msra.mxu1 %v298_v2  ;;  %v2765_v2 = vor.u32 %v2953_v1, %v2764_v0  ;;  %v305_v0 = vld [vmem:[#allocation7 + $0xa0] ss:$8 sm:$0xf] }
 0x2bd   :  { %v483_v7 = vperm.slane %v305_v0, 3 }
 0x32e   :  { %v253_v49 = vpop.f32.mrf.mxu1 }
 0x32f   :  { %v254_v50 = vadd.f32 %v2993_v48, %v253_v49  ;;  %v2652_v48 = vld [vmem:[#allocation8 + $0x280] sm:$0xf] }
 0x331   :  { %v256_v51 = vmax.f32 %v254_v50, 0.0  ;;  %v2925_v50 = vld [vmem:[#allocation8 + $0x28c] sm:$0xf0] }
 0x333   :  { %2317 = vmatmul.msk.f32.vlgmr.msrb.gmra.mxu2 %vm204_vm1, %v256_v51  ;;  %v2780_v51 = vld [vmem:[#allocation8 + $0x380] sm:$0xf] }
 0x334   :  { %473 = vmatpush.msrb.mxu2 %v291_v52  ;;  %v2957_v52 = vld [vmem:[#allocation8 + $0x38c] sm:$0xf0] }
 0x335   :  { %v2781_v54 = vor.u32 %v2957_v52, %v2780_v51  ;;  %v2903_v52 = vld [vmem:[#allocation8 + $0x1e4] sm:$0xf] }
 0x336   :  { %474 = vmatpush.msrb.mxu2 %v287_v53  ;;  %v2653_v53 = vor.u32 %v2925_v50, %v2652_v48  ;;  %v2867_v48 = vld [vmem:[#allocation8 + $0xc4] sm:$0xf] }
 0x33b   :  { %2321 = vmatmul.msk.f32.vlgmr.msra.gmra.mxu2 %vm313_vm2, %v312_v47  ;;  %v2893_v47 = vld [vmem:[#allocation8 + $0x18c] sm:$0xf0] }
 0x33c   :  { %570 = vmatpush.msra.mxu2 %v303_v59  ;;  %v2525_v49 = vor.u32 %v2893_v47, %v2524_v46  ;;  %v2889_v59 = vld [vmem:[#allocation8 + $0x16c] sm:$0xf0]  ;;  %v2449_v46 = vor.u32 %v2871_v43, %v2446_v44  ;;  %v2830_v47 = vld [vmem:[#allocation8 + $0x3f0] sm:$0xf0] }
 0x33d   :  { %v2509_v62 = vor.u32 %v2889_v59, %v2508_v57  ;;  %v2702_v57 = vld [vmem:[#allocation8 + $0x2f0] sm:$0xf0] }
 0x33e   :  { %571 = vmatpush.msra.mxu2 %v299_v61  ;;  %v2921_v61 = vld [vmem:[#allocation8 + $0x26c] sm:$0xf0]  ;;  %v2814_v59 = vld [vmem:[#allocation8 + $0x3d0] sm:$0xf0] }
 0x33f   :  { %v2637_v63 = vor.u32 %v2921_v61, %v2636_v60 }
 0x3b6   :  { %v281_v12 = vpop.f32.mrf.mxu2 }
 0x3b7   :  { %v282_v13 = vadd.f32 %v2994_v3, %v281_v12  ;;  %v2364_v3 = vld [vmem:[#allocation8 + $0x40] sm:$0xf] }
 0x3b8   :  { %v2365_v6 = vor.u32 %v2853_v4, %v2364_v3  ;;  %v2748_v12 = vld [vmem:[#allocation8 + $0x340] sm:$0xf]  ;;  %v482_v3 = vperm.slane %v305_v0, 2  ;;  %v480_v4 = vperm.slane %v305_v0, 0 }
 0x3b9   :  { %2322 = vmatmul.msk.f32.vlgmr.msra.gmra.mxu3 %vm204_vm1, %v282_v13  ;;  %2323 = vmatmul.msk.f32.vlgmr.msrb.gmra.mxu0 %vm204_vm1, %v282_v13 }
 0x3ba   :  { %2324 = vmatmul.msk.f32.vlgmr.msrb.gmra.mxu1 %vm204_vm1, %v282_v13  ;;  %2325 = vmatmul.msk.f32.vlgmr.msrb.gmra.mxu2 %vm204_vm1, %v282_v13  ;;  %v2949_v13 = vld [vmem:[#allocation8 + $0x34c] sm:$0xf0] }
 0x3bb   :  { %1551 = vmatpush.bf16.msra.mxu3 %v2445_v14  ;;  %1580 = vmatpush.bf16.msrb.mxu0 %v2573_v15  ;;  %v2348_v14 = vld [vmem:[#allocation8 + $0x20] sm:$0xf]  ;;  %v2749_v15 = vor.u32 %v2949_v13, %v2748_v12 }
 0x3bc   :  { %1609 = vmatpush.bf16.msrb.mxu1 %v2701_v16  ;;  %1638 = vmatpush.bf16.msrb.mxu2 %v2829_v17  ;;  %v2849_v16 = vld [vmem:[#allocation8 + $0x2c] sm:$0xf0]  ;;  %v2476_v17 = vld [vmem:[#allocation8 + $0x120] sm:$0xf] }
 0x3bd   :  { %v2349_v19 = vor.u32 %v2849_v16, %v2348_v14 }
 0x3bf   :  { %1552 = vmatpush.bf16.msra.mxu3 %v2429_v22  ;;  %1581 = vmatpush.bf16.msrb.mxu0 %v2557_v25  ;;  %v2913_v22 = vld [vmem:[#allocation8 + $0x22c] sm:$0xf0] }
 0x3c0   :  { %1610 = vmatpush.bf16.msrb.mxu1 %v2685_v28  ;;  %1639 = vmatpush.bf16.msrb.mxu2 %v2813_v30  ;;  %v2605_v24 = vor.u32 %v2913_v22, %v2604_v21  ;;  %v2945_v25 = vld [vmem:[#allocation8 + $0x32c] sm:$0xf0] }
 0x3c1   :  { %2326 = vmatmul.msk.f32.vlgmr.msrb.gmra.mxu3 %vm204_vm1, %v493_v18  ;;  %2327 = vmatmul.msk.f32.vlgmr.msra.gmra.mxu0 %vm204_vm1, %v493_v18  ;;  %v2733_v28 = vor.u32 %v2945_v25, %v2732_v23  ;;  %v2877_v30 = vld [vmem:[#allocation8 + $0x10c] sm:$0xf0] }
 0x3c2   :  { %2328 = vmatmul.msk.f32.vlgmr.msra.gmra.mxu1 %vm204_vm1, %v493_v18  ;;  %2329 = vmatmul.msk.f32.vlgmr.msra.gmra.mxu2 %vm204_vm1, %v493_v18  ;;  %v2881_v18 = vld [vmem:[#allocation8 + $0x12c] sm:$0xf0]  ;;  %v2461_v37 = vor.u32 %v2877_v30, %v2460_v29  ;;  %vm622_vm1 = vcmask 1045504  }
 0x3c3   :  { %1553 = vmatpush.bf16.msra.mxu3 %v2413_v34  ;;  %1582 = vmatpush.bf16.msrb.mxu0 %v2541_v38  ;;  %v2477_v20 = vor.u32 %v2881_v18, %v2476_v17  ;;  %v2909_v34 = vld [vmem:[#allocation8 + $0x20c] sm:$0xf0]  ;;  %v373_v38 = vpop.f32.mrf.mxu1  ;;  %v2863_v17 = vld [vmem:[#allocation8 + $0xa4] sm:$0xf]  ;;  %v2414_v18 = vld [vmem:[#allocation8 + $0xb0] sm:$0xf0] }
 0x3c4   :  { %1611 = vmatpush.bf16.msrb.mxu1 %v2669_v39  ;;  %1640 = vmatpush.bf16.msrb.mxu2 %v2797_v42  ;;  %v2589_v39 = vor.u32 %v2909_v34, %v2588_v31  ;;  %v393_v42 = vpop.f32.mrf.mxu2  ;;  %v2417_v23 = vor.u32 %v2863_v17, %v2414_v18  ;;  %v2686_v34 = vld [vmem:[#allocation8 + $0x2d0] sm:$0xf0] }
 0x3c7   :  { %1554 = vmatpush.bf16.msra.mxu3 %v2397_v45  ;;  %1583 = vmatpush.bf16.msrb.mxu0 %v2525_v49  ;;  %v2967_v45 = vld [vmem:[#allocation8 + $0x3e4] sm:$0xf]  ;;  %v2430_v49 = vld [vmem:[#allocation8 + $0xd0] sm:$0xf0] }
 0x3c8   :  { %1612 = vmatpush.bf16.msrb.mxu1 %v2653_v53  ;;  %1641 = vmatpush.bf16.msrb.mxu2 %v2781_v54  ;;  %v2833_v51 = vor.u32 %v2967_v45, %v2830_v47  ;;  %v2574_v53 = vld [vmem:[#allocation8 + $0x1f0] sm:$0xf0]  ;;  %v2935_v54 = vld [vmem:[#allocation8 + $0x2e4] sm:$0xf]  ;;  %v2433_v55 = vor.u32 %v2867_v48, %v2430_v49 }
 0x3c9   :  { %v2577_v56 = vor.u32 %v2903_v52, %v2574_v53  ;;  %v2705_v61 = vor.u32 %v2935_v54, %v2702_v57 }
 0x3cb   :  { %1555 = vmatpush.bf16.msra.mxu3 %v2381_v58  ;;  %1584 = vmatpush.bf16.msrb.mxu0 %v2509_v62  ;;  %v2963_v58 = vld [vmem:[#allocation8 + $0x3c4] sm:$0xf] }
 0x3cc   :  { %1613 = vmatpush.bf16.msrb.mxu1 %v2637_v63  ;;  %1642 = vmatpush.bf16.msrb.mxu2 %v2765_v2  ;;  %v2817_v62 = vor.u32 %v2963_v58, %v2814_v59  ;;  %v481_v2 = vperm.slane %v305_v0, 1 }
 0x3cf   :  { %1556 = vmatpush.bf16.msra.mxu3 %v2365_v6  ;;  %1585 = vmatpush.bf16.msrb.mxu0 %v2493_v10 }
 0x3d0   :  { %1614 = vmatpush.bf16.msrb.mxu1 %v2621_v11  ;;  %1643 = vmatpush.bf16.msrb.mxu2 %v2749_v15 }
 0x3d3   :  { %1557 = vmatpush.bf16.msra.mxu3 %v2349_v19  ;;  %1586 = vmatpush.bf16.msrb.mxu0 %v2477_v20  ;;  %v2899_v19 = vld [vmem:[#allocation8 + $0x1c4] sm:$0xf] }
 0x3d4   :  { %1615 = vmatpush.bf16.msrb.mxu1 %v2605_v24  ;;  %1644 = vmatpush.bf16.msrb.mxu2 %v2733_v28  ;;  %v2558_v24 = vld [vmem:[#allocation8 + $0x1d0] sm:$0xf0] }
 0x3d5   :  { %v2561_v28 = vor.u32 %v2899_v19, %v2558_v24  ;;  %v2859_v19 = vld [vmem:[#allocation8 + $0x84] sm:$0xf] }
 0x3d7   :  { %1558 = vmatpush.bf16.msra.mxu3 %v2333_v33  ;;  %1587 = vmatpush.bf16.msrb.mxu0 %v2461_v37  ;;  %v2931_v33 = vld [vmem:[#allocation8 + $0x2c4] sm:$0xf] }
 0x3d8   :  { %1616 = vmatpush.bf16.msrb.mxu1 %v2589_v39  ;;  %1645 = vmatpush.bf16.msrb.mxu2 %v2717_v40 }
 0x3db   :  { %1667 = vmatpush.bf16.msrb.mxu3 %v2449_v46  ;;  %1696 = vmatpush.bf16.msra.mxu0 %v2577_v56  ;;  %v2689_v46 = vor.u32 %v2931_v33, %v2686_v34 }
 0x3dc   :  { %1754 = vmatpush.bf16.msra.mxu2 %v2833_v51  ;;  %1725 = vmatpush.bf16.msra.mxu1 %v2705_v61 }
 0x3df   :  { %1668 = vmatpush.bf16.msrb.mxu3 %v2433_v55  ;;  %1697 = vmatpush.bf16.msra.mxu0 %v2561_v28  ;;  %v2542_v28 = vld [vmem:[#allocation8 + $0x1b0] sm:$0xf0] }
 0x3e0   :  { %1755 = vmatpush.bf16.msra.mxu2 %v2817_v62  ;;  %1726 = vmatpush.bf16.msra.mxu1 %v2689_v46 }
 0x3e3   :  { %1669 = vmatpush.bf16.msrb.mxu3 %v2417_v23  ;;  %v2398_v23 = vld [vmem:[#allocation8 + $0x90] sm:$0xf0] }
 0x436   :  { %v436_v50 = vpop.f32.mrf.mxu0 }
 0x437   :  { %v456_v60 = vpop.f32.mrf.mxu1  ;;  %v437_v5 = vadd.f32 %v436_v50, %v353_v32 }
 0x438   :  { %v457_v6 = vadd.f32 %v456_v60, %v373_v38 }
 0x439   :  { %v3220_v14 = vadd.f32 %v481_v2, %v437_v5 }
 0x43a   :  { %v3222_v15 = vadd.f32 %v482_v3, %v457_v6 }
 0x43c   :  { %v416_v63 = vpop.f32.mrf.mxu3 }
 0x43d   :  { %v476_v1 = vpop.f32.mrf.mxu2  ;;  %v417_v9 = vadd.f32 %v416_v63, %v333_v41 }
 0x43e   :  { %v533_v8 = vpop.f32.mrf.mxu0  ;;  %v477_v10 = vadd.f32 %v476_v1, %v393_v42 }
 0x43f   :  { %v553_v11 = vpop.f32.mrf.mxu1  ;;  %v3216_v12 = vrot.slane %v533_v8, 7  ;;  %v3224_v20 = vadd.f32 %v480_v4, %v417_v9  ;;  %v2959_v9 = vld [vmem:[#allocation8 + $0x3a4] sm:$0xf] }
 0x440   :  { %v3226_v21 = vrot.slane %v553_v11, 6  ;;  %v3230_v25 = vadd.f32 %v483_v7, %v477_v10  ;;  %v2798_v10 = vld [vmem:[#allocation8 + $0x3b0] sm:$0xf0] }
 0x444   :  { %v3218_v13 = vpop.f32.mrf.mxu3 }
 0x445   :  { %v573_v16 = vpop.f32.mrf.mxu2  ;;  %v584_v26 = vsel %vm583_vm3, %v3218_v13, %v3216_v12  ;;  %v590_v27 = vsel %vm589_vm6, %v3218_v13, %v3216_v12  ;;  %v596_v37 = vsel %vm585_vm4, %v3218_v13, %v3216_v12  ;;  %v602_v38 = vsel %vm591_vm7, %v3218_v13, %v3216_v12 }
 0x446   :  { %v3228_v22 = vrot.slane %v573_v16, 5 }
 0x448   :  { %v586_v29 = vsel %vm585_vm4, %v3226_v21, %v3228_v22  ;;  %v592_v30 = vsel %vm591_vm7, %v3226_v21, %v3228_v22  ;;  %v598_v31 = vsel %vm597_vm9, %v3226_v21, %v3228_v22  ;;  %v604_v32 = vsel %vm603_vm11, %v3226_v21, %v3228_v22 }
 0x449   :  { %v588_v35 = vsel %vm587_vm5, %v584_v26, %v586_v29  ;;  %v594_v36 = vsel %vm593_vm8, %v590_v27, %v592_v30  ;;  %v600_v44 = vsel %vm599_vm10, %v596_v37, %v598_v31  ;;  %v606_v45 = vsel %vm605_vm12, %v602_v38, %v604_v32  ;;  %v2895_v27 = vld [vmem:[#allocation8 + $0x1a4] sm:$0xf]  ;;  %v2670_v32 = vld [vmem:[#allocation8 + $0x2b0] sm:$0xf0] }
 0x44a   :  { %v595_v39 = vrot.slane %v594_v36, 1  ;;  %v630_v40 = vperm.slane %v588_v35, 0  ;;  %v631_v41 = vperm.slane %v588_v35, 1  ;;  %v632_v42 = vperm.slane %v588_v35, 2  ;;  %v2927_v31 = vld [vmem:[#allocation8 + $0x2a4] sm:$0xf] }
 0x44b   :  { %v633_v43 = vperm.slane %v588_v35, 3  ;;  %v601_v57 = vrot.slane %v600_v44, 2  ;;  %v607_v58 = vrot.slane %v606_v45, 3  ;;  %v2801_v35 = vor.u32 %v2959_v9, %v2798_v10  ;;  %v2955_v36 = vld [vmem:[#allocation8 + $0x384] sm:$0xf] }
 0x44c   :  { %v634_v47 = vperm.slane %v595_v39, 0  ;;  %v694_v48 = vadd.f32 %v630_v40, %v3224_v20  ;;  %v635_v49 = vperm.slane %v595_v39, 1  ;;  %v695_v50 = vadd.f32 %v631_v41, %v3220_v14  ;;  %v2782_v37 = vld [vmem:[#allocation8 + $0x390] sm:$0xf0] }
 0x44d   :  { %v636_v51 = vperm.slane %v595_v39, 2  ;;  %v696_v52 = vadd.f32 %v632_v42, %v3222_v15  ;;  %v637_v53 = vperm.slane %v595_v39, 3  ;;  %v697_v54 = vadd.f32 %v633_v43, %v3230_v25  ;;  %v2855_v43 = vld [vmem:[#allocation8 + $0x64] sm:$0xf]  ;;  %v2382_v44 = vld [vmem:[#allocation8 + $0x70] sm:$0xf0]  ;;  %1756 = vmatpush.bf16.msra.mxu2 %v2801_v35 }
 0x44e   :  { %v698_v55 = vadd.f32 %v634_v47, %v3224_v20  ;;  %v699_v56 = vadd.f32 %v635_v49, %v3220_v14  ;;  %v726_v61 = vmax.f32 %v694_v48, 0.0  ;;  %v727_v63 = vmax.f32 %v695_v50, 0.0  ;;  %v2891_v49 = vld [vmem:[#allocation8 + $0x184] sm:$0xf]  ;;  %v2526_v50 = vld [vmem:[#allocation8 + $0x190] sm:$0xf0] }
 0x44f   :  { %v700_v59 = vadd.f32 %v636_v51, %v3222_v15  ;;  %v701_v60 = vadd.f32 %v637_v53, %v3230_v25  ;;  %v728_v1 = vmax.f32 %v696_v52, 0.0  ;;  %v729_v3 = vmax.f32 %v697_v54, 0.0  ;;  %v2923_v51 = vld [vmem:[#allocation8 + $0x284] sm:$0xf] }
 0x450   :  { %v730_v62 = vmax.f32 %v698_v55, 0.0  ;;  %v731_v0 = vmax.f32 %v699_v56, 0.0  ;;  %v638_v7 = vperm.slane %v601_v57, 0  ;;  %v642_v8 = vperm.slane %v607_v58, 0  ;;  %v2654_v56 = vld [vmem:[#allocation8 + $0x290] sm:$0xf0] }
 0x451   :  { %v732_v2 = vmax.f32 %v700_v59, 0.0  ;;  %v733_v4 = vmax.f32 %v701_v60, 0.0  ;;  %v639_v17 = vperm.slane %v601_v57, 1  ;;  %v643_v18 = vperm.slane %v607_v58, 1 }
 0x452   :  { %v3268_v5 = vpack.c.bf16 %v730_v62, %v726_v61  ;;  %v3270_v6 = vpack.c.bf16 %v731_v0, %v727_v63  ;;  %v640_v24 = vperm.slane %v601_v57, 2  ;;  %v644_v26 = vperm.slane %v607_v58, 2 }
 0x453   :  { %v3272_v11 = vpack.c.bf16 %v732_v2, %v728_v1  ;;  %v3274_v16 = vpack.c.bf16 %v733_v4, %v729_v3  ;;  %v641_v29 = vperm.slane %v601_v57, 3  ;;  %v645_v30 = vperm.slane %v607_v58, 3  ;;  %v2951_v57 = vld [vmem:[#allocation8 + $0x364] sm:$0xf]  ;;  %v2766_v58 = vld [vmem:[#allocation8 + $0x370] sm:$0xf0] }
 0x454   :  { %1559 = vmatmul.bf16.vlgmr.msra.gmra.mxu3 %v3268_v5  ;;  %1588 = vmatmul.bf16.vlgmr.msrb.gmra.mxu0 %v3270_v6  ;;  %v702_v33 = vadd.f32 %v638_v7, %v3224_v20  ;;  %v706_v34 = vadd.f32 %v642_v8, %v3224_v20  ;;  %v608_v38 = vsel %vm597_vm9, %v3218_v13, %v3216_v12  ;;  %vm627_vm5 = vcmask 1046529  }
 0x455   :  { %1617 = vmatmul.bf16.vlgmr.msrb.gmra.mxu1 %v3272_v11  ;;  %1646 = vmatmul.bf16.vlgmr.msrb.gmra.mxu2 %v3274_v16  ;;  %v703_v39 = vadd.f32 %v639_v17, %v3220_v14  ;;  %v707_v40 = vadd.f32 %v643_v18, %v3220_v14  ;;  %v2401_v41 = vor.u32 %v2859_v19, %v2398_v23  ;;  %v2851_v23 = vld [vmem:[#allocation8 + $0x44] sm:$0xf] }
 0x456   :  { %v614_v42 = vsel %vm603_vm11, %v3218_v13, %v3216_v12  ;;  %v704_v45 = vadd.f32 %v640_v24, %v3222_v15  ;;  %v708_v46 = vadd.f32 %v644_v26, %v3222_v15  ;;  %v2545_v47 = vor.u32 %v2895_v27, %v2542_v28  ;;  %v2366_v24 = vld [vmem:[#allocation8 + $0x50] sm:$0xf0]  ;;  %v2887_v26 = vld [vmem:[#allocation8 + $0x164] sm:$0xf] }
 0x457   :  { %v2673_v48 = vor.u32 %v2927_v31, %v2670_v32  ;;  %v705_v52 = vadd.f32 %v641_v29, %v3230_v25  ;;  %v709_v53 = vadd.f32 %v645_v30, %v3230_v25  ;;  %1670 = vmatpush.bf16.msrb.mxu3 %v2401_v41  ;;  %v2785_v54 = vor.u32 %v2955_v36, %v2782_v37  ;;  %v2510_v27 = vld [vmem:[#allocation8 + $0x170] sm:$0xf0]  ;;  %v2919_v28 = vld [vmem:[#allocation8 + $0x264] sm:$0xf] }
 0x458   :  { %v610_v55 = vsel %vm609_vm14, %v3226_v21, %v3228_v22  ;;  %v734_v59 = vmax.f32 %v702_v33, 0.0  ;;  %v738_v60 = vmax.f32 %v706_v34, 0.0  ;;  %1698 = vmatpush.bf16.msra.mxu0 %v2545_v47  ;;  %v616_v62 = vsel %vm615_vm0, %v3228_v22, %v3226_v21  ;;  %v2638_v31 = vld [vmem:[#allocation8 + $0x270] sm:$0xf0]  ;;  %v2947_v32 = vld [vmem:[#allocation8 + $0x344] sm:$0xf] }
 0x459   :  { %1727 = vmatpush.bf16.msra.mxu1 %v2673_v48  ;;  %v612_v61 = vsel %vm611_vm13, %v608_v38, %v610_v55  ;;  %v735_v63 = vmax.f32 %v703_v39, 0.0  ;;  %v739_v0 = vmax.f32 %v707_v40, 0.0  ;;  %v618_v1 = vsel %vm617_vm15, %v614_v42, %v616_v62  ;;  %1757 = vmatpush.bf16.msra.mxu2 %v2785_v54  ;;  %v2750_v33 = vld [vmem:[#allocation8 + $0x350] sm:$0xf0]  ;;  %v2883_v55 = vld [vmem:[#allocation8 + $0x144] sm:$0xf] }
 0x45a   :  { %v2385_v2 = vor.u32 %v2855_v43, %v2382_v44  ;;  %v736_v3 = vmax.f32 %v704_v45, 0.0  ;;  %v2529_v4 = vor.u32 %v2891_v49, %v2526_v50  ;;  %v2657_v7 = vor.u32 %v2923_v51, %v2654_v56  ;;  %v2847_v50 = vld [vmem:[#allocation8 + $0x24] sm:$0xf]  ;;  %v2350_v51 = vld [vmem:[#allocation8 + $0x30] sm:$0xf0] }
 0x45b   :  { %v2769_v8 = vor.u32 %v2951_v57, %v2766_v58  ;;  %v740_v9 = vmax.f32 %v708_v46, 0.0  ;;  %v737_v10 = vmax.f32 %v705_v52, 0.0  ;;  %v741_v17 = vmax.f32 %v709_v53, 0.0  ;;  %v2494_v56 = vld [vmem:[#allocation8 + $0x150] sm:$0xf0] }
 0x45c   :  { %v613_v18 = vrot.slane %v612_v61, 4  ;;  %1671 = vmatpush.bf16.msrb.mxu3 %v2385_v2  ;;  %v619_v19 = vrot.slane %v618_v1, 5  ;;  %1699 = vmatpush.bf16.msra.mxu0 %v2529_v4  ;;  %v3302_v29 = vpack.c.bf16 %v738_v60, %v734_v59  ;;  %v3304_v30 = vpack.c.bf16 %v739_v0, %v735_v63  ;;  %v2915_v57 = vld [vmem:[#allocation8 + $0x244] sm:$0xf]  ;;  %v2622_v61 = vld [vmem:[#allocation8 + $0x250] sm:$0xf0] }
 0x45d   :  { %1728 = vmatpush.bf16.msra.mxu1 %v2657_v7  ;;  %1758 = vmatpush.bf16.msra.mxu2 %v2769_v8  ;;  %v3306_v34 = vpack.c.bf16 %v740_v9, %v736_v3  ;;  %v3308_v35 = vpack.c.bf16 %v741_v17, %v737_v10  ;;  %v2369_v42 = vor.u32 %v2851_v23, %v2366_v24  ;;  %v2734_v23 = vld [vmem:[#allocation8 + $0x330] sm:$0xf0]  ;;  %v2843_v24 = vld [vmem:[#allocation8 + $0x4] sm:$0xf] }
 0x45e   :  { %v646_v36 = vperm.slane %v613_v18, 0  ;;  %v647_v37 = vperm.slane %v613_v18, 1  ;;  %v650_v38 = vperm.slane %v619_v19, 0  ;;  %v651_v39 = vperm.slane %v619_v19, 1 }
 0x45f   :  { %v648_v40 = vperm.slane %v613_v18, 2  ;;  %v652_v41 = vperm.slane %v619_v19, 2  ;;  %v2513_v43 = vor.u32 %v2887_v26, %v2510_v27  ;;  %v2641_v44 = vor.u32 %v2919_v28, %v2638_v31  ;;  %v2334_v26 = vld [vmem:[#allocation8 + $0x10] sm:$0xf0]  ;;  %v2879_v27 = vld [vmem:[#allocation8 + $0x124] sm:$0xf] }
 0x460   :  { %v2753_v45 = vor.u32 %v2947_v32, %v2750_v33  ;;  %v3315_v46 = vadd.f32 %v646_v36, %v3224_v20  ;;  %v3318_v47 = vadd.f32 %v647_v37, %v3220_v14  ;;  %v649_v48 = vperm.slane %v613_v18, 3  ;;  %1672 = vmatpush.bf16.msrb.mxu3 %v2369_v42  ;;  %v2606_v28 = vld [vmem:[#allocation8 + $0x230] sm:$0xf0]  ;;  %v2875_v37 = vld [vmem:[#allocation8 + $0x104] sm:$0xf] }
 0x461   :  { %v653_v49 = vperm.slane %v619_v19, 3  ;;  %v714_v52 = vadd.f32 %v650_v38, %v3224_v20  ;;  %v712_v53 = vadd.f32 %v648_v40, %v3222_v15  ;;  %1700 = vmatpush.bf16.msra.mxu0 %v2513_v43  ;;  %v2353_v54 = vor.u32 %v2847_v50, %v2350_v51  ;;  %1729 = vmatpush.bf16.msra.mxu1 %v2641_v44  ;;  %v2943_v19 = vld [vmem:[#allocation8 + $0x324] sm:$0xf]  ;;  %v2462_v40 = vld [vmem:[#allocation8 + $0x110] sm:$0xf0] }
 0x462   :  { %v715_v58 = vadd.f32 %v651_v39, %v3220_v14  ;;  %v716_v59 = vadd.f32 %v652_v41, %v3222_v15  ;;  %1759 = vmatpush.bf16.msra.mxu2 %v2753_v45  ;;  %v2497_v60 = vor.u32 %v2883_v55, %v2494_v56  ;;  %v621_v62 = vsel %vm583_vm3, %v3226_v21, %v3228_v22  ;;  %v2907_v41 = vld [vmem:[#allocation8 + $0x204] sm:$0xf]  ;;  %v2590_v42 = vld [vmem:[#allocation8 + $0x210] sm:$0xf0] }
 0x463   :  { %v626_v63 = vsel %vm589_vm6, %v3226_v21, %v3228_v22  ;;  %v2625_v0 = vor.u32 %v2915_v57, %v2622_v61  ;;  %v713_v1 = vadd.f32 %v649_v48, %v3230_v25  ;;  %v717_v2 = vadd.f32 %v653_v49, %v3230_v25  ;;  %v2939_v45 = vld [vmem:[#allocation8 + $0x304] sm:$0xf] }
 0x464   :  { %1564 = vmatmul.bf16.gmra.mxu3 %v3302_v29  ;;  %1593 = vmatmul.bf16.gmra.mxu0 %v3304_v30  ;;  %v620_v3 = vsel %vm609_vm14, %v3218_v13, %v3216_v12  ;;  %v625_v4 = vsel %vm615_vm0, %v3216_v12, %v3218_v13  ;;  %v742_v7 = vmax.f32 %v3315_v46, 0.0  ;;  %v746_v8 = vmax.f32 %v714_v52, 0.0  ;;  %v2478_v12 = vld [vmem:[#allocation8 + $0x130] sm:$0xf0]  ;;  %v2911_v13 = vld [vmem:[#allocation8 + $0x224] sm:$0xf] }
 0x465   :  { %1622 = vmatmul.bf16.gmra.mxu1 %v3306_v34  ;;  %1651 = vmatmul.bf16.gmra.mxu2 %v3308_v35  ;;  %v743_v9 = vmax.f32 %v3318_v47, 0.0  ;;  %v744_v21 = vmax.f32 %v712_v53, 0.0  ;;  %v747_v22 = vmax.f32 %v715_v58, 0.0  ;;  %v748_v10 = vmax.f32 %v716_v59, 0.0  ;;  %v2718_v46 = vld [vmem:[#allocation8 + $0x310] sm:$0xf0] }
 0x466   :  { %1673 = vmatpush.bf16.msrb.mxu3 %v2353_v54  ;;  %1701 = vmatpush.bf16.msra.mxu0 %v2497_v60  ;;  %v623_v17 = vsel %vm622_vm1, %v621_v62, %v620_v3  ;;  %v628_v18 = vsel %vm627_vm5, %v626_v63, %v625_v4  ;;  %v745_v31 = vmax.f32 %v713_v1, 0.0  ;;  %v749_v32 = vmax.f32 %v717_v2, 0.0  ;;  %v2452_v62 = vld [vmem:[#allocation8 + $0xe8] sm:$0xf]  ;;  %v2874_v63 = vld [vmem:[#allocation8 + $0xf4] sm:$0xf0] }
 0x467   :  { %1730 = vmatpush.bf16.msra.mxu1 %v2625_v0  ;;  %v3341_v33 = vrot.slane %v623_v17, 6  ;;  %v3343_v36 = vrot.slane %v628_v18, 7  ;;  %v2737_v38 = vor.u32 %v2943_v19, %v2734_v23  ;;  %v2337_v39 = vor.u32 %v2843_v24, %v2334_v26  ;;  %v2836_v0 = vld [vmem:[#allocation8 + $0x3e8] sm:$0xf]  ;;  %v2970_v2 = vld [vmem:[#allocation8 + $0x3f4] sm:$0xf0] }
 0x468   :  { %v2481_v43 = vor.u32 %v2879_v27, %v2478_v12  ;;  %v2609_v44 = vor.u32 %v2911_v13, %v2606_v28  ;;  %v3345_v47 = vpack.c.bf16 %v746_v8, %v742_v7  ;;  %v3347_v48 = vpack.c.bf16 %v747_v22, %v743_v9  ;;  %v2436_v3 = vld [vmem:[#allocation8 + $0xc8] sm:$0xf]  ;;  %v2870_v4 = vld [vmem:[#allocation8 + $0xd4] sm:$0xf0] }
 0x469   :  { %v3349_v49 = vpack.c.bf16 %v748_v10, %v744_v21  ;;  %1760 = vmatpush.bf16.msra.mxu2 %v2737_v38  ;;  %v3351_v50 = vpack.c.bf16 %v749_v32, %v745_v31  ;;  %v654_v51 = vperm.slane %v3341_v33, 0  ;;  %v2465_v52 = vor.u32 %v2875_v37, %v2462_v40  ;;  %v2580_v8 = vld [vmem:[#allocation8 + $0x1e8] sm:$0xf]  ;;  %v2906_v9 = vld [vmem:[#allocation8 + $0x1f4] sm:$0xf0] }
 0x46a   :  { %1674 = vmatpush.bf16.msrb.mxu3 %v2337_v39  ;;  %1702 = vmatpush.bf16.msra.mxu0 %v2481_v43  ;;  %v2593_v53 = vor.u32 %v2907_v41, %v2590_v42  ;;  %v658_v54 = vperm.slane %v3343_v36, 0  ;;  %v655_v55 = vperm.slane %v3341_v33, 1  ;;  %v659_v56 = vperm.slane %v3343_v36, 1  ;;  %v2708_v21 = vld [vmem:[#allocation8 + $0x2e8] sm:$0xf] }
 0x46b   :  { %1731 = vmatpush.bf16.msra.mxu1 %v2609_v44  ;;  %v2721_v57 = vor.u32 %v2939_v45, %v2718_v46  ;;  %v656_v58 = vperm.slane %v3341_v33, 2  ;;  %v660_v59 = vperm.slane %v3343_v36, 2  ;;  %v657_v60 = vperm.slane %v3341_v33, 3  ;;  %v2938_v17 = vld [vmem:[#allocation8 + $0x2f4] sm:$0xf0] }
 0x46c   :  { %v661_v61 = vperm.slane %v3343_v36, 3  ;;  %v2453_v1 = vor.u32 %v2874_v63, %v2452_v62  ;;  %v2837_v7 = vor.u32 %v2970_v2, %v2836_v0  ;;  %v2437_v22 = vor.u32 %v2870_v4, %v2436_v3  ;;  %v2820_v18 = vld [vmem:[#allocation8 + $0x3c8] sm:$0xf]  ;;  %v2966_v19 = vld [vmem:[#allocation8 + $0x3d4] sm:$0xf0] }
 0x46d   :  { %1761 = vmatpush.bf16.msra.mxu2 %v2721_v57  ;;  %v2581_v10 = vor.u32 %v2906_v9, %v2580_v8  ;;  %v2709_v23 = vor.u32 %v2938_v17, %v2708_v21  ;;  %v2821_v24 = vor.u32 %v2966_v19, %v2820_v18  ;;  %v718_v26 = vadd.f32 %v654_v51, %v3224_v20  ;;  %v2866_v45 = vld [vmem:[#allocation8 + $0xb4] sm:$0xf0]  ;;  %v2564_v46 = vld [vmem:[#allocation8 + $0x1c8] sm:$0xf] }
 0x46e   :  { %1703 = vmatpush.bf16.msra.mxu0 %v2465_v52  ;;  %1783 = vmatpush.bf16.msra.mxu3 %v2453_v1  ;;  %v722_v27 = vadd.f32 %v658_v54, %v3224_v20  ;;  %v719_v12 = vadd.f32 %v655_v55, %v3220_v14  ;;  %v723_v13 = vadd.f32 %v659_v56, %v3220_v14  ;;  %v2902_v52 = vld [vmem:[#allocation8 + $0x1d4] sm:$0xf0]  ;;  %v2804_v57 = vld [vmem:[#allocation8 + $0x3a8] sm:$0xf]  ;;  %vm2168_vm3 = vcmask 1047559  }
 0x46f   :  { %1732 = vmatpush.bf16.msra.mxu1 %v2593_v53  ;;  %v720_v28 = vadd.f32 %v656_v58, %v3222_v15  ;;  %v724_v31 = vadd.f32 %v660_v59, %v3222_v15  ;;  %v721_v32 = vadd.f32 %v657_v60, %v3230_v25  ;;  %v725_v33 = vadd.f32 %v661_v61, %v3230_v25  ;;  %v2420_v25 = vld [vmem:[#allocation8 + $0xa8] sm:$0xf]  ;;  %v2934_v54 = vld [vmem:[#allocation8 + $0x2d4] sm:$0xf0] }
 0x470   :  { %v750_v36 = vmax.f32 %v718_v26, 0.0  ;;  %v754_v37 = vmax.f32 %v722_v27, 0.0  ;;  %v751_v38 = vmax.f32 %v719_v12, 0.0  ;;  %v755_v20 = vmax.f32 %v723_v13, 0.0  ;;  %v2692_v53 = vld [vmem:[#allocation8 + $0x2c8] sm:$0xf] }
 0x471   :  { %1870 = vmatpush.bf16.msrb.mxu2 %v2837_v7  ;;  %v752_v39 = vmax.f32 %v720_v28, 0.0  ;;  %v756_v40 = vmax.f32 %v724_v31, 0.0  ;;  %v753_v41 = vmax.f32 %v721_v32, 0.0  ;;  %v757_v14 = vmax.f32 %v725_v33, 0.0  ;;  %v2962_v58 = vld [vmem:[#allocation8 + $0x3b4] sm:$0xf0] }
 0x472   :  { %1812 = vmatpush.bf16.msrb.mxu0 %v2581_v10  ;;  %1784 = vmatpush.bf16.msra.mxu3 %v2437_v22  ;;  %v3373_v42 = vpack.c.bf16 %v754_v37, %v750_v36  ;;  %v3375_v43 = vpack.c.bf16 %v755_v20, %v751_v38  ;;  %v2421_v51 = vor.u32 %v2866_v45, %v2420_v25  ;;  %v2404_v59 = vld [vmem:[#allocation8 + $0x88] sm:$0xf]  ;;  %v2862_v61 = vld [vmem:[#allocation8 + $0x94] sm:$0xf0] }
 0x473   :  { %1841 = vmatpush.bf16.msrb.mxu1 %v2709_v23  ;;  %v3377_v15 = vpack.c.bf16 %v756_v40, %v752_v39  ;;  %v3379_v44 = vpack.c.bf16 %v757_v14, %v753_v41  ;;  %v2565_v55 = vor.u32 %v2902_v52, %v2564_v46  ;;  %v2693_v56 = vor.u32 %v2934_v54, %v2692_v53  ;;  %v2548_v62 = vld [vmem:[#allocation8 + $0x1a8] sm:$0xf]  ;;  %v2898_v63 = vld [vmem:[#allocation8 + $0x1b4] sm:$0xf0] }
 0x474   :  { %1569 = vmatmul.bf16.gmra.mxu3 %v3345_v47  ;;  %1598 = vmatmul.bf16.gmra.mxu0 %v3347_v48  ;;  %v2805_v60 = vor.u32 %v2962_v58, %v2804_v57  ;;  %v2405_v0 = vor.u32 %v2862_v61, %v2404_v59  ;;  %v2549_v1 = vor.u32 %v2898_v63, %v2548_v62  ;;  %v2676_v2 = vld [vmem:[#allocation8 + $0x2a8] sm:$0xf]  ;;  %v2930_v3 = vld [vmem:[#allocation8 + $0x2b4] sm:$0xf0] }
 0x475   :  { %1627 = vmatmul.bf16.gmra.mxu1 %v3349_v49  ;;  %1656 = vmatmul.bf16.gmra.mxu2 %v3351_v50  ;;  %v2788_v4 = vld [vmem:[#allocation8 + $0x388] sm:$0xf]  ;;  %v2677_v7 = vor.u32 %v2930_v3, %v2676_v2  ;;  %v2958_v8 = vld [vmem:[#allocation8 + $0x394] sm:$0xf0] }
 0x476   :  { %1871 = vmatpush.bf16.msrb.mxu2 %v2821_v24  ;;  %1785 = vmatpush.bf16.msra.mxu3 %v2421_v51  ;;  %v2789_v9 = vor.u32 %v2958_v8, %v2788_v4  ;;  %v2388_v21 = vld [vmem:[#allocation8 + $0x68] sm:$0xf]  ;;  %v2858_v22 = vld [vmem:[#allocation8 + $0x74] sm:$0xf0] }
 0x477   :  { %1813 = vmatpush.bf16.msrb.mxu0 %v2565_v55  ;;  %1842 = vmatpush.bf16.msrb.mxu1 %v2693_v56  ;;  %v2532_v10 = vld [vmem:[#allocation8 + $0x188] sm:$0xf]  ;;  %v2389_v17 = vor.u32 %v2858_v22, %v2388_v21  ;;  %v2894_v18 = vld [vmem:[#allocation8 + $0x194] sm:$0xf0] }
 0x478   :  { %v2660_v19 = vld [vmem:[#allocation8 + $0x288] sm:$0xf]  ;;  %v2926_v23 = vld [vmem:[#allocation8 + $0x294] sm:$0xf0]  ;;  %v2533_v24 = vor.u32 %v2894_v18, %v2532_v10 }
 0x479   :  { %v2661_v26 = vor.u32 %v2926_v23, %v2660_v19  ;;  %v2772_v27 = vld [vmem:[#allocation8 + $0x368] sm:$0xf]  ;;  %v2954_v12 = vld [vmem:[#allocation8 + $0x374] sm:$0xf0]  ;;  %v2872_v23 = vld [vmem:[#allocation8 + $0xec] sm:$0xf] }
 0x47a   :  { %1872 = vmatpush.bf16.msrb.mxu2 %v2805_v60  ;;  %1786 = vmatpush.bf16.msra.mxu3 %v2405_v0  ;;  %v2372_v13 = vld [vmem:[#allocation8 + $0x48] sm:$0xf]  ;;  %v2773_v28 = vor.u32 %v2954_v12, %v2772_v27  ;;  %v2854_v31 = vld [vmem:[#allocation8 + $0x54] sm:$0xf0]  ;;  %v2968_v27 = vld [vmem:[#allocation8 + $0x3ec] sm:$0xf] }
 0x47b   :  { %1814 = vmatpush.bf16.msrb.mxu0 %v2549_v1  ;;  %1843 = vmatpush.bf16.msrb.mxu1 %v2677_v7  ;;  %v2516_v32 = vld [vmem:[#allocation8 + $0x168] sm:$0xf]  ;;  %v2890_v33 = vld [vmem:[#allocation8 + $0x174] sm:$0xf0]  ;;  %v2373_v36 = vor.u32 %v2854_v31, %v2372_v13  ;;  %v2838_v12 = vld [vmem:[#allocation8 + $0x3f8] sm:$0xf0] }
 0x47c   :  { %v2517_v37 = vor.u32 %v2890_v33, %v2516_v32  ;;  %v2644_v38 = vld [vmem:[#allocation8 + $0x268] sm:$0xf]  ;;  %v2922_v20 = vld [vmem:[#allocation8 + $0x274] sm:$0xf0]  ;;  %v2868_v13 = vld [vmem:[#allocation8 + $0xcc] sm:$0xf] }
 0x47d   :  { %v2756_v39 = vld [vmem:[#allocation8 + $0x348] sm:$0xf]  ;;  %v2645_v40 = vor.u32 %v2922_v20, %v2644_v38  ;;  %v2950_v41 = vld [vmem:[#allocation8 + $0x354] sm:$0xf0]  ;;  %v2438_v31 = vld [vmem:[#allocation8 + $0xd8] sm:$0xf0] }
 0x47e   :  { %1873 = vmatpush.bf16.msrb.mxu2 %v2789_v9  ;;  %1787 = vmatpush.bf16.msra.mxu3 %v2389_v17  ;;  %v2757_v14 = vor.u32 %v2950_v41, %v2756_v39  ;;  %v2356_v25 = vld [vmem:[#allocation8 + $0x28] sm:$0xf]  ;;  %v2850_v45 = vld [vmem:[#allocation8 + $0x34] sm:$0xf0]  ;;  %v2904_v32 = vld [vmem:[#allocation8 + $0x1ec] sm:$0xf] }
 0x47f   :  { %1815 = vmatpush.bf16.msrb.mxu0 %v2533_v24  ;;  %1844 = vmatpush.bf16.msrb.mxu1 %v2661_v26  ;;  %v2500_v46 = vld [vmem:[#allocation8 + $0x148] sm:$0xf]  ;;  %v2357_v51 = vor.u32 %v2850_v45, %v2356_v25  ;;  %v2886_v52 = vld [vmem:[#allocation8 + $0x154] sm:$0xf0]  ;;  %v2454_v24 = vld [vmem:[#allocation8 + $0xf8] sm:$0xf0] }
 0x480   :  { %v2628_v53 = vld [vmem:[#allocation8 + $0x248] sm:$0xf]  ;;  %v2918_v54 = vld [vmem:[#allocation8 + $0x254] sm:$0xf0]  ;;  %v2501_v55 = vor.u32 %v2886_v52, %v2500_v46  ;;  %v2457_v26 = vor.u32 %v2872_v23, %v2454_v24  ;;  %v2582_v33 = vld [vmem:[#allocation8 + $0x1f8] sm:$0xf0] }
 0x481   :  { %v2629_v56 = vor.u32 %v2918_v54, %v2628_v53  ;;  %v2740_v57 = vld [vmem:[#allocation8 + $0x328] sm:$0xf]  ;;  %v2946_v58 = vld [vmem:[#allocation8 + $0x334] sm:$0xf0]  ;;  %v2936_v38 = vld [vmem:[#allocation8 + $0x2ec] sm:$0xf] }
 0x482   :  { %1874 = vmatpush.bf16.msrb.mxu2 %v2773_v28  ;;  %1788 = vmatpush.bf16.msra.mxu3 %v2373_v36  ;;  %v2340_v59 = vld [vmem:[#allocation8 + $0x8] sm:$0xf]  ;;  %v2741_v60 = vor.u32 %v2946_v58, %v2740_v57  ;;  %v2846_v61 = vld [vmem:[#allocation8 + $0x14] sm:$0xf0]  ;;  %v2841_v28 = vor.u32 %v2968_v27, %v2838_v12  ;;  %v2441_v36 = vor.u32 %v2868_v13, %v2438_v31  ;;  %v2710_v20 = vld [vmem:[#allocation8 + $0x2f8] sm:$0xf0] }
 0x483   :  { %1816 = vmatpush.bf16.msrb.mxu0 %v2517_v37  ;;  %1845 = vmatpush.bf16.msrb.mxu1 %v2645_v40  ;;  %v2484_v62 = vld [vmem:[#allocation8 + $0x128] sm:$0xf]  ;;  %v2882_v63 = vld [vmem:[#allocation8 + $0x134] sm:$0xf0]  ;;  %v2341_v0 = vor.u32 %v2846_v61, %v2340_v59  ;;  %v2585_v37 = vor.u32 %v2904_v32, %v2582_v33  ;;  %v2713_v39 = vor.u32 %v2936_v38, %v2710_v20  ;;  %v2964_v40 = vld [vmem:[#allocation8 + $0x3cc] sm:$0xf] }
 0x484   :  { %1574 = vmatmul.bf16.gmra.mxu3 %v3373_v42  ;;  %1603 = vmatmul.bf16.gmra.mxu0 %v3375_v43  ;;  %v2485_v1 = vor.u32 %v2882_v63, %v2484_v62  ;;  %v2612_v2 = vld [vmem:[#allocation8 + $0x228] sm:$0xf]  ;;  %v2914_v3 = vld [vmem:[#allocation8 + $0x234] sm:$0xf0]  ;;  %v2822_v41 = vld [vmem:[#allocation8 + $0x3d8] sm:$0xf0] }
 0x485   :  { %1632 = vmatmul.bf16.gmra.mxu1 %v3377_v15  ;;  %1661 = vmatmul.bf16.gmra.mxu2 %v3379_v44  ;;  %v2613_v4 = vor.u32 %v2914_v3, %v2612_v2  ;;  %v2468_v7 = vld [vmem:[#allocation8 + $0x108] sm:$0xf]  ;;  %v2878_v8 = vld [vmem:[#allocation8 + $0x114] sm:$0xf0]  ;;  %v2825_v25 = vor.u32 %v2964_v40, %v2822_v41  ;;  %v2422_v45 = vld [vmem:[#allocation8 + $0xb8] sm:$0xf0] }
 0x486   :  { %1875 = vmatpush.bf16.msrb.mxu2 %v2757_v14  ;;  %1789 = vmatpush.bf16.msra.mxu3 %v2357_v51  ;;  %v2596_v9 = vld [vmem:[#allocation8 + $0x208] sm:$0xf]  ;;  %v2469_v21 = vor.u32 %v2878_v8, %v2468_v7  ;;  %v2910_v22 = vld [vmem:[#allocation8 + $0x214] sm:$0xf0]  ;;  %v2864_v14 = vld [vmem:[#allocation8 + $0xac] sm:$0xf] }
 0x487   :  { %1817 = vmatpush.bf16.msrb.mxu0 %v2501_v55  ;;  %1846 = vmatpush.bf16.msrb.mxu1 %v2629_v56  ;;  %v2724_v10 = vld [vmem:[#allocation8 + $0x308] sm:$0xf]  ;;  %v2942_v17 = vld [vmem:[#allocation8 + $0x314] sm:$0xf0]  ;;  %v2597_v18 = vor.u32 %v2910_v22, %v2596_v9  ;;  %v2900_v46 = vld [vmem:[#allocation8 + $0x1cc] sm:$0xf]  ;;  %v2425_v52 = vor.u32 %v2864_v14, %v2422_v45 }
 0x488   :  { %v2725_v19 = vor.u32 %v2942_v17, %v2724_v10  ;;  %v2566_v51 = vld [vmem:[#allocation8 + $0x1d8] sm:$0xf0]  ;;  %v2932_v54 = vld [vmem:[#allocation8 + $0x2cc] sm:$0xf] }
 0x489   :  { %v2569_v53 = vor.u32 %v2900_v46, %v2566_v51  ;;  %v2694_v55 = vld [vmem:[#allocation8 + $0x2d8] sm:$0xf0]  ;;  %v3401_v58 = vld [vmem:[#allocation7 + $0xa1] ss:$8 sm:$0xf] }
 0x48a   :  { %1876 = vmatpush.bf16.msrb.mxu2 %v2741_v60  ;;  %1790 = vmatpush.bf16.msra.mxu3 %v2341_v0  ;;  %v2697_v56 = vor.u32 %v2932_v54, %v2694_v55  ;;  %v2960_v60 = vld [vmem:[#allocation8 + $0x3ac] sm:$0xf]  ;;  %v2806_v61 = vld [vmem:[#allocation8 + $0x3b8] sm:$0xf0]  ;;  %v3406_v3 = vperm.slane %v3401_v58, 0 }
 0x48b   :  { %1818 = vmatpush.bf16.msrb.mxu0 %v2485_v1  ;;  %1847 = vmatpush.bf16.msrb.mxu1 %v2613_v4  ;;  %v2860_v62 = vld [vmem:[#allocation8 + $0x8c] sm:$0xf]  ;;  %v2809_v63 = vor.u32 %v2960_v60, %v2806_v61  ;;  %v2406_v0 = vld [vmem:[#allocation8 + $0x98] sm:$0xf0] }
 0x48c   :  { %v2896_v1 = vld [vmem:[#allocation8 + $0x1ac] sm:$0xf]  ;;  %v2550_v2 = vld [vmem:[#allocation8 + $0x1b8] sm:$0xf0]  ;;  %v2409_v4 = vor.u32 %v2860_v62, %v2406_v0 }
 0x48d   :  { %v2553_v7 = vor.u32 %v2896_v1, %v2550_v2  ;;  %v2928_v8 = vld [vmem:[#allocation8 + $0x2ac] sm:$0xf]  ;;  %v2678_v9 = vld [vmem:[#allocation8 + $0x2b8] sm:$0xf0] }
 0x48e   :  { %1877 = vmatpush.bf16.msrb.mxu2 %v2725_v19  ;;  %v2956_v24 = vld [vmem:[#allocation8 + $0x38c] sm:$0xf]  ;;  %v2390_v13 = vld [vmem:[#allocation8 + $0x78] sm:$0xf0] }
 0x48f   :  { %1819 = vmatpush.bf16.msrb.mxu0 %v2469_v21  ;;  %1848 = vmatpush.bf16.msrb.mxu1 %v2597_v18  ;;  %v2681_v21 = vor.u32 %v2928_v8, %v2678_v9  ;;  %v2856_v27 = vld [vmem:[#allocation8 + $0x6c] sm:$0xf]  ;;  %v2534_v31 = vld [vmem:[#allocation8 + $0x198] sm:$0xf0] }
 0x490   :  { %v2393_v33 = vor.u32 %v2856_v27, %v2390_v13  ;;  %v2662_v38 = vld [vmem:[#allocation8 + $0x298] sm:$0xf0]  ;;  %v2952_v51 = vld [vmem:[#allocation8 + $0x36c] sm:$0xf] }
 0x491   :  { %v2374_v55 = vld [vmem:[#allocation8 + $0x58] sm:$0xf0]  ;;  %v2920_v62 = vld [vmem:[#allocation8 + $0x26c] sm:$0xf] }
 0x492   :  { %v2916_v13 = vld [vmem:[#allocation8 + $0x24c] sm:$0xf] }
 0x494   :  { %1675 = vmatmul.bf16.vlgmr.msrb.gmra.mxu3 %v3268_v5  ;;  %1704 = vmatmul.bf16.vlgmr.msra.gmra.mxu0 %v3270_v6 }
 0x495   :  { %1733 = vmatmul.bf16.vlgmr.msra.gmra.mxu1 %v3272_v11  ;;  %1762 = vmatmul.bf16.vlgmr.msra.gmra.mxu2 %v3274_v16 }
 0x496   :  { %1899 = vmatpush.bf16.msrb.mxu3 %v2457_v26  ;;  %1986 = vmatpush.bf16.msra.mxu2 %v2841_v28  ;;  %v2790_v26 = vld [vmem:[#allocation8 + $0x398] sm:$0xf0]  ;;  %v2892_v28 = vld [vmem:[#allocation8 + $0x18c] sm:$0xf] }
 0x497   :  { %1928 = vmatpush.bf16.msra.mxu0 %v2585_v37  ;;  %1957 = vmatpush.bf16.msra.mxu1 %v2713_v39  ;;  %v2793_v12 = vor.u32 %v2956_v24, %v2790_v26  ;;  %v2924_v37 = vld [vmem:[#allocation8 + $0x28c] sm:$0xf]  ;;  %v2502_v24 = vld [vmem:[#allocation8 + $0x158] sm:$0xf0] }
 0x498   :  { %v2665_v20 = vor.u32 %v2924_v37, %v2662_v38 }
 0x49a   :  { %1900 = vmatpush.bf16.msrb.mxu3 %v2441_v36  ;;  %1987 = vmatpush.bf16.msra.mxu2 %v2825_v25  ;;  %v2537_v36 = vor.u32 %v2892_v28, %v2534_v31  ;;  %v2630_v28 = vld [vmem:[#allocation8 + $0x258] sm:$0xf0] }
 0x49b   :  { %1929 = vmatpush.bf16.msra.mxu0 %v2569_v53  ;;  %1958 = vmatpush.bf16.msra.mxu1 %v2697_v56  ;;  %v2852_v53 = vld [vmem:[#allocation8 + $0x4c] sm:$0xf]  ;;  %v2633_v31 = vor.u32 %v2916_v13, %v2630_v28 }
 0x49c   :  { %v2888_v56 = vld [vmem:[#allocation8 + $0x16c] sm:$0xf]  ;;  %v2377_v60 = vor.u32 %v2852_v53, %v2374_v55 }
 0x49e   :  { %1901 = vmatpush.bf16.msrb.mxu3 %v2425_v52  ;;  %1988 = vmatpush.bf16.msra.mxu2 %v2809_v63  ;;  %v2774_v52 = vld [vmem:[#allocation8 + $0x378] sm:$0xf0] }
 0x49f   :  { %1930 = vmatpush.bf16.msra.mxu0 %v2553_v7  ;;  %1959 = vmatpush.bf16.msra.mxu1 %v2681_v21  ;;  %v2777_v54 = vor.u32 %v2952_v51, %v2774_v52  ;;  %v2646_v63 = vld [vmem:[#allocation8 + $0x278] sm:$0xf0]  ;;  %v2880_v51 = vld [vmem:[#allocation8 + $0x12c] sm:$0xf] }
 0x4a0   :  { %v2649_v0 = vor.u32 %v2920_v62, %v2646_v63  ;;  %v2486_v52 = vld [vmem:[#allocation8 + $0x138] sm:$0xf0] }
 0x4a1   :  { %v2489_v55 = vor.u32 %v2880_v51, %v2486_v52 }
 0x4a2   :  { %1902 = vmatpush.bf16.msrb.mxu3 %v2409_v4  ;;  %1989 = vmatpush.bf16.msra.mxu2 %v2793_v12 }
 0x4a3   :  { %1931 = vmatpush.bf16.msra.mxu0 %v2537_v36  ;;  %1960 = vmatpush.bf16.msra.mxu1 %v2665_v20 }
 0x4a4   :  { %1680 = vmatmul.bf16.gmra.mxu3 %v3302_v29  ;;  %1709 = vmatmul.bf16.gmra.mxu0 %v3304_v30 }
 0x4a5   :  { %1738 = vmatmul.bf16.gmra.mxu1 %v3306_v34  ;;  %1767 = vmatmul.bf16.gmra.mxu2 %v3308_v35 }
 0x4a6   :  { %1903 = vmatpush.bf16.msrb.mxu3 %v2393_v33  ;;  %1990 = vmatpush.bf16.msra.mxu2 %v2777_v54 }
 0x4a7   :  { %1961 = vmatpush.bf16.msra.mxu1 %v2649_v0 }
 0x4aa   :  { %1904 = vmatpush.bf16.msrb.mxu3 %v2377_v60 }
 0x4ab   :  { %1962 = vmatpush.bf16.msra.mxu1 %v2633_v31 }
 0x4b4   :  { %1685 = vmatmul.bf16.gmra.mxu3 %v3345_v47  ;;  %1714 = vmatmul.bf16.gmra.mxu0 %v3347_v48 }
 0x4b5   :  { %1743 = vmatmul.bf16.gmra.mxu1 %v3349_v49  ;;  %1772 = vmatmul.bf16.gmra.mxu2 %v3351_v50 }
 0x4c4   :  { %1690 = vmatmul.bf16.gmra.mxu3 %v3373_v42  ;;  %1719 = vmatmul.bf16.gmra.mxu0 %v3375_v43 }
 0x4c5   :  { %1748 = vmatmul.bf16.gmra.mxu1 %v3377_v15  ;;  %1777 = vmatmul.bf16.gmra.mxu2 %v3379_v44 }
 0x4d1   :  { %v1589_v57 = vpop.f32.mrf.mxu0 }
 0x4d2   :  { %v1618_v59 = vpop.f32.mrf.mxu1 }
 0x4d4   :  { %1791 = vmatmul.bf16.vlgmr.msra.gmra.mxu3 %v3268_v5  ;;  %1820 = vmatmul.bf16.vlgmr.msrb.gmra.mxu0 %v3270_v6 }
 0x4d5   :  { %1849 = vmatmul.bf16.vlgmr.msrb.gmra.mxu1 %v3272_v11  ;;  %1878 = vmatmul.bf16.vlgmr.msrb.gmra.mxu2 %v3274_v16 }
 0x4d7   :  { %v1560_v22 = vpop.f32.mrf.mxu3 }
 0x4d8   :  { %v1561_v10 = vadd.f32 %v1560_v22, %v3406_v3  ;;  %v1647_v17 = vpop.f32.mrf.mxu2  ;;  %v2948_v22 = vld [vmem:[#allocation8 + $0x34c] sm:$0xf] }
 0x4d9   :  { %v1591_v18 = vpop.f32.mrf.mxu0 }
 0x4da   :  { %v1590_v19 = vadd.f32 %v1589_v57, %v1561_v10  ;;  %v1620_v23 = vpop.f32.mrf.mxu1  ;;  %v2518_v57 = vld [vmem:[#allocation8 + $0x178] sm:$0xf0] }
 0x4db   :  { %v2521_v61 = vor.u32 %v2888_v56, %v2518_v57  ;;  %v2758_v10 = vld [vmem:[#allocation8 + $0x358] sm:$0xf0]  ;;  %v2912_v56 = vld [vmem:[#allocation8 + $0x22c] sm:$0xf] }
 0x4dc   :  { %v1619_v32 = vadd.f32 %v1618_v59, %v1590_v19  ;;  %v2358_v19 = vld [vmem:[#allocation8 + $0x38] sm:$0xf0] }
 0x4dd   :  { %1932 = vmatpush.bf16.msra.mxu0 %v2521_v61  ;;  %v2614_v57 = vld [vmem:[#allocation8 + $0x238] sm:$0xf0] }
 0x4de   :  { %v3411_v39 = vadd.f32 %v1647_v17, %v1619_v32  ;;  %v2848_v17 = vld [vmem:[#allocation8 + $0x2c] sm:$0xf] }
 0x4df   :  { %v1562_v40 = vpop.f32.mrf.mxu3  ;;  %v2361_v27 = vor.u32 %v2848_v17, %v2358_v19  ;;  %v2726_v17 = vld [vmem:[#allocation8 + $0x318] sm:$0xf0] }
 0x4e0   :  { %v1563_v41 = vadd.f32 %v1562_v40, %v3406_v3  ;;  %v1649_v14 = vpop.f32.mrf.mxu2 }
 0x4e1   :  { %v1594_v25 = vpop.f32.mrf.mxu0  ;;  %1905 = vmatpush.bf16.msrb.mxu3 %v2361_v27 }
 0x4e2   :  { %v1592_v45 = vadd.f32 %v1591_v18, %v1563_v41  ;;  %v1623_v46 = vpop.f32.mrf.mxu1  ;;  %v2761_v18 = vor.u32 %v2948_v22, %v2758_v10  ;;  %v2944_v41 = vld [vmem:[#allocation8 + $0x32c] sm:$0xf]  ;;  %v2598_v22 = vld [vmem:[#allocation8 + $0x218] sm:$0xf0] }
 0x4e3   :  { %v2940_v10 = vld [vmem:[#allocation8 + $0x30c] sm:$0xf] }
 0x4e4   :  { %v1621_v59 = vadd.f32 %v1620_v23, %v1592_v45  ;;  %1796 = vmatmul.bf16.gmra.mxu3 %v3302_v29  ;;  %1825 = vmatmul.bf16.gmra.mxu0 %v3304_v30  ;;  %v2884_v23 = vld [vmem:[#allocation8 + $0x14c] sm:$0xf] }
 0x4e5   :  { %1854 = vmatmul.bf16.gmra.mxu1 %v3306_v34  ;;  %1883 = vmatmul.bf16.gmra.mxu2 %v3308_v35  ;;  %v2505_v12 = vor.u32 %v2884_v23, %v2502_v24  ;;  %v2729_v23 = vor.u32 %v2940_v10, %v2726_v17 }
 0x4e6   :  { %v3418_v1 = vadd.f32 %v1649_v14, %v1621_v59  ;;  %1991 = vmatpush.bf16.msra.mxu2 %v2761_v18  ;;  %v2742_v14 = vld [vmem:[#allocation8 + $0x338] sm:$0xf0]  ;;  %v2617_v59 = vor.u32 %v2912_v56, %v2614_v57  ;;  %v3447_v57 = vperm.slane %v3401_v58, 1 }
 0x4e7   :  { %v1565_v2 = vpop.f32.mrf.mxu3  ;;  %1933 = vmatpush.bf16.msra.mxu0 %v2505_v12  ;;  %v2745_v45 = vor.u32 %v2944_v41, %v2742_v14 }
 0x4e8   :  { %v1566_v4 = vadd.f32 %v1565_v2, %v3406_v3  ;;  %v1652_v7 = vpop.f32.mrf.mxu2  ;;  %1963 = vmatpush.bf16.msra.mxu1 %v2617_v59 }
 0x4e9   :  { %v1596_v8 = vpop.f32.mrf.mxu0 }
 0x4ea   :  { %v1595_v9 = vadd.f32 %v1594_v25, %v1566_v4  ;;  %v1625_v21 = vpop.f32.mrf.mxu1  ;;  %v2844_v25 = vld [vmem:[#allocation8 + $0xc] sm:$0xf]  ;;  %1992 = vmatpush.bf16.msra.mxu2 %v2745_v45 }
 0x4eb   :  { %1934 = vmatpush.bf16.msra.mxu0 %v2489_v55 }
 0x4ec   :  { %v1624_v26 = vadd.f32 %v1623_v46, %v1595_v9  ;;  %v2342_v46 = vld [vmem:[#allocation8 + $0x18] sm:$0xf0]  ;;  %v2908_v9 = vld [vmem:[#allocation8 + $0x20c] sm:$0xf] }
 0x4ed   :  { %v2345_v54 = vor.u32 %v2844_v25, %v2342_v46  ;;  %v2601_v19 = vor.u32 %v2908_v9, %v2598_v22 }
 0x4ee   :  { %v3421_v32 = vadd.f32 %v1652_v7, %v1624_v26  ;;  %v2876_v7 = vld [vmem:[#allocation8 + $0x10c] sm:$0xf]  ;;  %1993 = vmatpush.bf16.msra.mxu2 %v2729_v23 }
 0x4ef   :  { %v1567_v33 = vpop.f32.mrf.mxu3  ;;  %1906 = vmatpush.bf16.msrb.mxu3 %v2345_v54  ;;  %1964 = vmatpush.bf16.msra.mxu1 %v2601_v19 }
 0x4f0   :  { %v1568_v36 = vadd.f32 %v1567_v33, %v3406_v3  ;;  %v1654_v37 = vpop.f32.mrf.mxu2 }
 0x4f1   :  { %v1599_v38 = vpop.f32.mrf.mxu0 }
 0x4f2   :  { %v1597_v20 = vadd.f32 %v1596_v8, %v1568_v36  ;;  %v1628_v40 = vpop.f32.mrf.mxu1  ;;  %v2470_v8 = vld [vmem:[#allocation8 + $0x118] sm:$0xf0] }
 0x4f4   :  { %v1626_v53 = vadd.f32 %v1625_v21, %v1597_v20  ;;  %1801 = vmatmul.bf16.gmra.mxu3 %v3345_v47  ;;  %1830 = vmatmul.bf16.gmra.mxu0 %v3347_v48  ;;  %v2473_v21 = vor.u32 %v2876_v7, %v2470_v8 }
 0x4f5   :  { %1859 = vmatmul.bf16.gmra.mxu1 %v3349_v49  ;;  %1888 = vmatmul.bf16.gmra.mxu2 %v3351_v50 }
 0x4f6   :  { %v3428_v60 = vadd.f32 %v1654_v37, %v1626_v53  ;;  %1935 = vmatpush.bf16.msra.mxu0 %v2473_v21 }
 0x4f7   :  { %v1570_v61 = vpop.f32.mrf.mxu3 }
 0x4f8   :  { %v1571_v62 = vadd.f32 %v1570_v61, %v3406_v3  ;;  %v1657_v63 = vpop.f32.mrf.mxu2 }
 0x4f9   :  { %v1601_v0 = vpop.f32.mrf.mxu0 }
 0x4fa   :  { %v1600_v2 = vadd.f32 %v1599_v38, %v1571_v62  ;;  %v1630_v4 = vpop.f32.mrf.mxu1 }
 0x4fc   :  { %v1629_v18 = vadd.f32 %v1628_v40, %v1600_v2 }
 0x4fe   :  { %v3431_v24 = vadd.f32 %v1657_v63, %v1629_v18 }
 0x4ff   :  { %v1572_v26 = vpop.f32.mrf.mxu3 }
 0x500   :  { %v1573_v27 = vadd.f32 %v1572_v26, %v3406_v3  ;;  %v1659_v12 = vpop.f32.mrf.mxu2 }
 0x501   :  { %v1604_v13 = vpop.f32.mrf.mxu0 }
 0x502   :  { %v1602_v28 = vadd.f32 %v1601_v0, %v1573_v27  ;;  %v1633_v31 = vpop.f32.mrf.mxu1  ;;  %v2019_v27 = vmax.f32 %v3418_v1, 0.0 }
 0x504   :  { %v1631_v33 = vadd.f32 %v1630_v4, %v1602_v28  ;;  %1806 = vmatmul.bf16.gmra.mxu3 %v3373_v42  ;;  %1835 = vmatmul.bf16.gmra.mxu0 %v3375_v43  ;;  %v3454_v4 = vld [vmem:[#allocation7 + $0xa2] ss:$8 sm:$0xf] }
 0x505   :  { %1864 = vmatmul.bf16.gmra.mxu1 %v3377_v15  ;;  %1893 = vmatmul.bf16.gmra.mxu2 %v3379_v44  ;;  %v3458_v7 = vperm.slane %v3454_v4, 0 }
 0x506   :  { %v3438_v36 = vadd.f32 %v1659_v12, %v1631_v33 }
 0x507   :  { %v1575_v37 = vpop.f32.mrf.mxu3 }
 0x508   :  { %v1576_v38 = vadd.f32 %v1575_v37, %v3406_v3  ;;  %v1662_v20 = vpop.f32.mrf.mxu2 }
 0x509   :  { %v1606_v40 = vpop.f32.mrf.mxu0 }
 0x50a   :  { %v1605_v41 = vadd.f32 %v1604_v13, %v1576_v38  ;;  %v1635_v14 = vpop.f32.mrf.mxu1  ;;  %v2060_v38 = vmul.f32 %v3458_v7, %v2019_v27 }
 0x50c   :  { %v1634_v25 = vadd.f32 %v1633_v31, %v1605_v41 }
 0x50e   :  { %v3441_v45 = vadd.f32 %v1662_v20, %v1634_v25 }
 0x50f   :  { %v1577_v46 = vpop.f32.mrf.mxu3 }
 0x510   :  { %v1578_v51 = vadd.f32 %v1577_v46, %v3406_v3  ;;  %v1664_v52 = vpop.f32.mrf.mxu2 }
 0x511   :  { %v1705_v53 = vpop.f32.mrf.mxu0 }
 0x512   :  { %v1607_v54 = vadd.f32 %v1606_v40, %v1578_v51  ;;  %v1734_v55 = vpop.f32.mrf.mxu1 }
 0x514   :  { %v1636_v56 = vadd.f32 %v1635_v14, %v1607_v54  ;;  %1907 = vmatmul.bf16.vlgmr.msrb.gmra.mxu3 %v3268_v5  ;;  %1936 = vmatmul.bf16.vlgmr.msra.gmra.mxu0 %v3270_v6  ;;  %v2015_v6 = vmax.f32 %v3411_v39, 0.0 }
 0x515   :  { %1965 = vmatmul.bf16.vlgmr.msra.gmra.mxu1 %v3272_v11  ;;  %1994 = vmatmul.bf16.vlgmr.msra.gmra.mxu2 %v3274_v16  ;;  %v3461_v16 = vperm.slane %v3454_v4, 1 }
 0x516   :  { %v3451_v59 = vadd.f32 %v1664_v52, %v1636_v56  ;;  %v2056_v17 = vmul.f32 %v3458_v7, %v2015_v6 }
 0x517   :  { %v1676_v61 = vpop.f32.mrf.mxu3 }
 0x518   :  { %v1677_v3 = vadd.f32 %v1676_v61, %v3447_v57  ;;  %v1763_v62 = vpop.f32.mrf.mxu2 }
 0x519   :  { %v1707_v63 = vpop.f32.mrf.mxu0 }
 0x51a   :  { %v1706_v0 = vadd.f32 %v1705_v53, %v1677_v3  ;;  %v1736_v2 = vpop.f32.mrf.mxu1 }
 0x51c   :  { %v1735_v5 = vadd.f32 %v1734_v55, %v1706_v0 }
 0x51e   :  { %v1764_v11 = vadd.f32 %v1763_v62, %v1735_v5 }
 0x51f   :  { %v1678_v8 = vpop.f32.mrf.mxu3 }
 0x520   :  { %v2016_v9 = vmax.f32 %v1764_v11, 0.0  ;;  %v1679_v21 = vadd.f32 %v1678_v8, %v3447_v57  ;;  %v1765_v22 = vpop.f32.mrf.mxu2 }
 0x521   :  { %v1710_v10 = vpop.f32.mrf.mxu0 }
 0x522   :  { %v2057_v18 = vmul.f32 %v3461_v16, %v2016_v9  ;;  %v1708_v19 = vadd.f32 %v1707_v63, %v1679_v21  ;;  %v1739_v23 = vpop.f32.mrf.mxu1 }
 0x524   :  { %v1737_v39 = vadd.f32 %v1736_v2, %v1708_v19  ;;  %1912 = vmatmul.bf16.gmra.mxu3 %v3302_v29  ;;  %1941 = vmatmul.bf16.gmra.mxu0 %v3304_v30  ;;  %v3468_v26 = vadd.f32 %v2057_v18, %v2056_v17 }
 0x525   :  { %1970 = vmatmul.bf16.gmra.mxu1 %v3306_v34  ;;  %1999 = vmatmul.bf16.gmra.mxu2 %v3308_v35  ;;  %v2023_v35 = vmax.f32 %v3421_v32, 0.0  ;;  %v2027_v32 = vmax.f32 %v3428_v60, 0.0 }
 0x526   :  { %v1766_v12 = vadd.f32 %v1765_v22, %v1737_v39 }
 0x527   :  { %v1681_v13 = vpop.f32.mrf.mxu3  ;;  %v2064_v52 = vmul.f32 %v3458_v7, %v2023_v35  ;;  %v2068_v6 = vmul.f32 %v3458_v7, %v2027_v32 }
 0x528   :  { %v2020_v28 = vmax.f32 %v1766_v12, 0.0  ;;  %v1682_v31 = vadd.f32 %v1681_v13, %v3447_v57  ;;  %v1768_v33 = vpop.f32.mrf.mxu2 }
 0x529   :  { %v1712_v37 = vpop.f32.mrf.mxu0 }
 0x52a   :  { %v2061_v29 = vmul.f32 %v3461_v16, %v2020_v28  ;;  %v1711_v30 = vadd.f32 %v1710_v10, %v1682_v31  ;;  %v1741_v20 = vpop.f32.mrf.mxu1 }
 0x52c   :  { %v3476_v40 = vadd.f32 %v2061_v29, %v2060_v38  ;;  %v1740_v34 = vadd.f32 %v1739_v23, %v1711_v30 }
 0x52e   :  { %v1769_v41 = vadd.f32 %v1768_v33, %v1740_v34 }
 0x52f   :  { %v1683_v1 = vpop.f32.mrf.mxu3 }
 0x530   :  { %v2024_v14 = vmax.f32 %v1769_v41, 0.0  ;;  %v1684_v25 = vadd.f32 %v1683_v1, %v3447_v57  ;;  %v1770_v46 = vpop.f32.mrf.mxu2 }
 0x531   :  { %v1715_v51 = vpop.f32.mrf.mxu0 }
 0x532   :  { %v2065_v53 = vmul.f32 %v3461_v16, %v2024_v14  ;;  %v1713_v54 = vadd.f32 %v1712_v37, %v1684_v25  ;;  %v1744_v55 = vpop.f32.mrf.mxu1 }
 0x534   :  { %v3482_v56 = vadd.f32 %v2065_v53, %v2064_v52  ;;  %v1742_v61 = vadd.f32 %v1741_v20, %v1713_v54  ;;  %1917 = vmatmul.bf16.gmra.mxu3 %v3345_v47  ;;  %1946 = vmatmul.bf16.gmra.mxu0 %v3347_v48 }
 0x535   :  { %1975 = vmatmul.bf16.gmra.mxu1 %v3349_v49  ;;  %2004 = vmatmul.bf16.gmra.mxu2 %v3351_v50  ;;  %v2031_v50 = vmax.f32 %v3431_v24, 0.0  ;;  %v2035_v24 = vmax.f32 %v3438_v36, 0.0 }
 0x536   :  { %v1771_v3 = vadd.f32 %v1770_v46, %v1742_v61 }
 0x537   :  { %v1686_v62 = vpop.f32.mrf.mxu3  ;;  %v2072_v18 = vmul.f32 %v3458_v7, %v2031_v50  ;;  %v2076_v29 = vmul.f32 %v3458_v7, %v2035_v24 }
 0x538   :  { %v2028_v63 = vmax.f32 %v1771_v3, 0.0  ;;  %v1687_v0 = vadd.f32 %v1686_v62, %v3447_v57  ;;  %v1773_v2 = vpop.f32.mrf.mxu2 }
 0x539   :  { %v1717_v5 = vpop.f32.mrf.mxu0 }
 0x53a   :  { %v2069_v11 = vmul.f32 %v3461_v16, %v2028_v63  ;;  %v1716_v47 = vadd.f32 %v1715_v51, %v1687_v0  ;;  %v1746_v8 = vpop.f32.mrf.mxu1 }
 0x53c   :  { %v3492_v48 = vadd.f32 %v2069_v11, %v2068_v6  ;;  %v1745_v49 = vadd.f32 %v1744_v55, %v1716_v47  ;;  %v2043_v55 = vmax.f32 %v3451_v59, 0.0 }
 0x53e   :  { %v1774_v9 = vadd.f32 %v1773_v2, %v1745_v49 }
 0x53f   :  { %v1688_v60 = vpop.f32.mrf.mxu3 }
 0x540   :  { %v2032_v21 = vmax.f32 %v1774_v9, 0.0  ;;  %v1689_v22 = vadd.f32 %v1688_v60, %v3447_v57  ;;  %v1775_v10 = vpop.f32.mrf.mxu2 }
 0x541   :  { %v1720_v17 = vpop.f32.mrf.mxu0 }
 0x542   :  { %v2073_v19 = vmul.f32 %v3461_v16, %v2032_v21  ;;  %v1718_v23 = vadd.f32 %v1717_v5, %v1689_v22  ;;  %v1749_v39 = vpop.f32.mrf.mxu1  ;;  %v310_v21 = vld [vmem:[#allocation7 + $0xa3] ss:$0 sm:$0xff]  ;;  %v3153_v22 = vmov 0  }
 0x543   :  { %2985 = vset.pattern.permute.xlu2 %v3153_v22  ;;  %2987 = vset.pattern.permute.xlu0 %v3153_v22 }
 0x544   :  { %v3498_v27 = vadd.f32 %v2073_v19, %v2072_v18  ;;  %v1747_v12 = vadd.f32 %v1746_v8, %v1718_v23  ;;  %1922 = vmatmul.bf16.gmra.mxu3 %v3373_v42  ;;  %1951 = vmatmul.bf16.gmra.mxu0 %v3375_v43 }
 0x545   :  { %1980 = vmatmul.bf16.gmra.mxu1 %v3377_v15  ;;  %2009 = vmatmul.bf16.gmra.mxu2 %v3379_v44  ;;  %v2039_v44 = vmax.f32 %v3441_v45, 0.0 }
 0x546   :  { %v1776_v13 = vadd.f32 %v1775_v10, %v1747_v12  ;;  %2130 = vperm.xlu2 %2985, %v310_v21   ;;  %2986 = vset.pattern.permute.xlu1 %v3153_v22 }
 0x547   :  { %v1691_v28 = vpop.f32.mrf.mxu3  ;;  %v2080_v25 = vmul.f32 %v3458_v7, %v2039_v44 }
 0x548   :  { %v2036_v31 = vmax.f32 %v1776_v13, 0.0  ;;  %v1692_v33 = vadd.f32 %v1691_v28, %v3447_v57  ;;  %v1778_v37 = vpop.f32.mrf.mxu2  ;;  %v3550_v13 = vperm.slane %v3401_v58, 2 }
 0x549   :  { %v1722_v38 = vpop.f32.mrf.mxu0 }
 0x54a   :  { %v2077_v30 = vmul.f32 %v3461_v16, %v2036_v31  ;;  %v1721_v42 = vadd.f32 %v1720_v17, %v1692_v33  ;;  %v1751_v20 = vpop.f32.mrf.mxu1 }
 0x54c   :  { %v3508_v43 = vadd.f32 %v2077_v30, %v2076_v29  ;;  %v1750_v15 = vadd.f32 %v1749_v39, %v1721_v42 }
 0x54e   :  { %v1779_v34 = vadd.f32 %v1778_v37, %v1750_v15 }
 0x54f   :  { %v1693_v36 = vpop.f32.mrf.mxu3 }
 0x550   :  { %v2040_v35 = vmax.f32 %v1779_v34, 0.0  ;;  %v1694_v41 = vadd.f32 %v1693_v36, %v3447_v57  ;;  %v1780_v1 = vpop.f32.mrf.mxu2  ;;  %v2084_v57 = vmul.f32 %v3458_v7, %v2043_v55  ;;  %v3567_v36 = vperm.slane %v3401_v58, 3 }
 0x551   :  { %v1821_v14 = vpop.f32.mrf.mxu0 }
 0x552   :  { %v2081_v46 = vmul.f32 %v3461_v16, %v2040_v35  ;;  %v1723_v51 = vadd.f32 %v1722_v38, %v1694_v41  ;;  %v1850_v52 = vpop.f32.mrf.mxu1 }
 0x554   :  { %v3514_v53 = vadd.f32 %v2081_v46, %v2080_v25  ;;  %v1752_v54 = vadd.f32 %v1751_v20, %v1723_v51 }
 0x556   :  { %v1781_v61 = vadd.f32 %v1780_v1, %v1752_v54 }
 0x557   :  { %v1792_v45 = vpop.f32.mrf.mxu3 }
 0x558   :  { %v2044_v32 = vmax.f32 %v1781_v61, 0.0  ;;  %v1879_v3 = vpop.f32.mrf.mxu2  ;;  %v1793_v33 = vadd.f32 %v1792_v45, %v3550_v13 }
 0x559   :  { %v1823_v62 = vpop.f32.mrf.mxu0 }
 0x55a   :  { %v2085_v63 = vmul.f32 %v3461_v16, %v2044_v32  ;;  %v1852_v0 = vpop.f32.mrf.mxu1  ;;  %v1822_v29 = vadd.f32 %v1821_v14, %v1793_v33  ;;  %v3571_v14 = vperm.slane %v3454_v4, 2 }
 0x55c   :  { %v3519_v2 = vadd.f32 %v2085_v63, %v2084_v57  ;;  %v1851_v20 = vadd.f32 %v1850_v52, %v1822_v29  ;;  %v3576_v63 = vperm.slane %v3454_v4, 3 }
 0x55e   :  { %v1880_v35 = vadd.f32 %v1879_v3, %v1851_v20 }
 0x55f   :  { %v1794_v5 = vpop.f32.mrf.mxu3 }
 0x560   :  { %v1881_v6 = vpop.f32.mrf.mxu2  ;;  %v1795_v15 = vadd.f32 %v1794_v5, %v3550_v13  ;;  %v2017_v51 = vmax.f32 %v1880_v35, 0.0 }
 0x561   :  { %v1826_v11 = vpop.f32.mrf.mxu0 }
 0x562   :  { %v1855_v47 = vpop.f32.mrf.mxu1  ;;  %v1824_v41 = vadd.f32 %v1823_v62, %v1795_v15  ;;  %v2058_v58 = vmul.f32 %v3571_v14, %v2017_v51 }
 0x564   :  { %v1853_v54 = vadd.f32 %v1852_v0, %v1824_v41 }
 0x566   :  { %v1882_v57 = vadd.f32 %v1881_v6, %v1853_v54 }
 0x567   :  { %v1797_v8 = vpop.f32.mrf.mxu3 }
 0x568   :  { %v3521_v49 = vpop.f32.mrf.mxu2  ;;  %v1798_v52 = vadd.f32 %v1797_v8, %v3550_v13  ;;  %v2021_v0 = vmax.f32 %v1882_v57, 0.0  ;;  %v2089_v8 = vadd.f32 %v3468_v26, %v2058_v58 }
 0x569   :  { %v3523_v59 = vpop.f32.mrf.mxu0 }
 0x56a   :  { %v3525_v50 = vpop.f32.mrf.mxu1  ;;  %v1827_v3 = vadd.f32 %v1826_v11, %v1798_v52  ;;  %v2062_v4 = vmul.f32 %v3571_v14, %v2021_v0 }
 0x56c   :  { %v1856_v20 = vadd.f32 %v1855_v47, %v1827_v3 }
 0x56e   :  { %v1885_v41 = vadd.f32 %v3521_v49, %v1856_v20 }
 0x56f   :  { %v1799_v9 = vpop.f32.mrf.mxu3 }
 0x570   :  { %v3527_v60 = vpop.f32.mrf.mxu2  ;;  %v1800_v15 = vadd.f32 %v1799_v9, %v3550_v13  ;;  %v2025_v52 = vmax.f32 %v1885_v41, 0.0 }
 0x571   :  { %v3529_v7 = vpop.f32.mrf.mxu0 }
 0x572   :  { %v3531_v16 = vpop.f32.mrf.mxu1  ;;  %v2066_v3 = vmul.f32 %v3571_v14, %v2025_v52 }
 0x577   :  { %v3533_v10 = vpop.f32.mrf.mxu3 }
 0x578   :  { %v3535_v17 = vpop.f32.mrf.mxu2  ;;  %v1803_v9 = vadd.f32 %v3533_v10, %v3550_v13 }
 0x579   :  { %v3537_v18 = vpop.f32.mrf.mxu0 }
 0x57a   :  { %v3539_v19 = vpop.f32.mrf.mxu1  ;;  %v1832_v57 = vadd.f32 %v3529_v7, %v1803_v9 }
 0x57f   :  { %v3541_v23 = vpop.f32.mrf.mxu3 }
 0x580   :  { %v3543_v39 = vpop.f32.mrf.mxu2 }
 0x581   :  { %v3545_v12 = vpop.f32.mrf.mxu0 }
 0x582   :  { %v3547_v24 = vpop.f32.mrf.mxu1 }
 0x587   :  { %v3552_v28 = vpop.f32.mrf.mxu3 }
 0x588   :  { %v3554_v31 = vpop.f32.mrf.mxu2 }
 0x589   :  { %v3557_v37 = vpop.f32.mrf.mxu0 }
 0x58a   :  { %v3559_v38 = vpop.f32.mrf.mxu1 }
 0x58f   :  { %v3561_v30 = vpop.f32.mrf.mxu3 }
 0x590   :  { %v3563_v42 = vpop.f32.mrf.mxu2 }
 0x591   :  { %v1937_v44 = vpop.f32.mrf.mxu0 }
 0x592   :  { %v1966_v34 = vpop.f32.mrf.mxu1 }
 0x597   :  { %v1908_v1 = vpop.f32.mrf.mxu3 }
 0x598   :  { %v1909_v25 = vadd.f32 %v1908_v1, %v3567_v36  ;;  %v1995_v46 = vpop.f32.mrf.mxu2  ;;  %v1829_v1 = vadd.f32 %v3523_v59, %v1800_v15 }
 0x599   :  { %v1939_v55 = vpop.f32.mrf.mxu0 }
 0x59a   :  { %v1938_v61 = vadd.f32 %v1937_v44, %v1909_v25  ;;  %v1968_v45 = vpop.f32.mrf.mxu1 }
 0x59c   :  { %v1967_v32 = vadd.f32 %v1966_v34, %v1938_v61  ;;  %v1858_v61 = vadd.f32 %v3525_v50, %v1829_v1  ;;  %v1861_v50 = vadd.f32 %v3531_v16, %v1832_v57 }
 0x59e   :  { %v1996_v62 = vadd.f32 %v1995_v46, %v1967_v32 }
 0x59f   :  { %v1910_v5 = vpop.f32.mrf.mxu3 }
 0x5a0   :  { %v2018_v21 = vmax.f32 %v1996_v62, 0.0  ;;  %v1911_v22 = vadd.f32 %v1910_v5, %v3567_v36  ;;  %v1997_v33 = vpop.f32.mrf.mxu2  ;;  %v1887_v62 = vadd.f32 %v3527_v60, %v1858_v61 }
 0x5a1   :  { %v1942_v29 = vpop.f32.mrf.mxu0 }
 0x5a2   :  { %v1940_v44 = vadd.f32 %v1939_v55, %v1911_v22  ;;  %v1971_v34 = vpop.f32.mrf.mxu1  ;;  %v2059_v6 = vmul.f32 %v3576_v63, %v2018_v21  ;;  %v2094_v55 = vadd.f32 %v3476_v40, %v2062_v4  ;;  %v2029_v0 = vmax.f32 %v1887_v62, 0.0 }
 0x5a4   :  { %v1969_v11 = vadd.f32 %v1968_v45, %v1940_v44  ;;  %v2090_v35 = vadd.f32 %v2089_v8, %v2059_v6  ;;  %v2099_v8 = vadd.f32 %v3482_v56, %v2066_v3  ;;  %v1890_v44 = vadd.f32 %v3535_v17, %v1861_v50 }
 0x5a6   :  { %v1998_v25 = vadd.f32 %v1997_v33, %v1969_v11  ;;  %2091 = vadd.xlane.f32.xlu1 %v2090_v35  ;;  %v1805_v33 = vadd.f32 %v3541_v23, %v3550_v13  ;;  %v2070_v11 = vmul.f32 %v3571_v14, %v2029_v0  ;;  %v2033_v1 = vmax.f32 %v1890_v44, 0.0 }
 0x5a7   :  { %v1913_v46 = vpop.f32.mrf.mxu3 }
 0x5a8   :  { %v2022_v51 = vmax.f32 %v1998_v25, 0.0  ;;  %v1914_v26 = vadd.f32 %v1913_v46, %v3567_v36  ;;  %v2000_v47 = vpop.f32.mrf.mxu2  ;;  %v1808_v25 = vadd.f32 %v3552_v28, %v3550_v13 }
 0x5a9   :  { %v1944_v54 = vpop.f32.mrf.mxu0 }
 0x5aa   :  { %v2063_v49 = vmul.f32 %v3576_v63, %v2022_v51  ;;  %v1943_v45 = vadd.f32 %v1942_v29, %v1914_v26  ;;  %v1973_v59 = vpop.f32.mrf.mxu1 }
 0x5ac   :  { %v1972_v32 = vadd.f32 %v1971_v34, %v1943_v45  ;;  %v2095_v58 = vadd.f32 %v2094_v55, %v2063_v49  ;;  %v1834_v34 = vadd.f32 %v3537_v18, %v1805_v33  ;;  %v2104_v18 = vadd.f32 %v3492_v48, %v2070_v11 }
 0x5ad   :  { %v1837_v55 = vadd.f32 %v3545_v12, %v1808_v25 }
 0x5ae   :  { %v2001_v5 = vadd.f32 %v2000_v47, %v1972_v32  ;;  %2096 = vadd.xlane.f32.xlu1 %v2095_v58  ;;  %v1863_v56 = vadd.f32 %v3539_v19, %v1834_v34  ;;  %v2074_v47 = vmul.f32 %v3571_v14, %v2033_v1  ;;  %v1810_v58 = vadd.f32 %v3561_v30, %v3550_v13 }
 0x5af   :  { %v1915_v10 = vpop.f32.mrf.mxu3  ;;  %v1866_v32 = vadd.f32 %v3547_v24, %v1837_v55 }
 0x5b0   :  { %v2026_v21 = vmax.f32 %v2001_v5, 0.0  ;;  %v1916_v40 = vadd.f32 %v1915_v10, %v3567_v36  ;;  %v2002_v22 = vpop.f32.mrf.mxu2  ;;  %v1892_v9 = vadd.f32 %v3543_v39, %v1863_v56  ;;  %v2109_v48 = vadd.f32 %v3498_v27, %v2074_v47 }
 0x5b1   :  { %v1947_v20 = vpop.f32.mrf.mxu0  ;;  %v1895_v5 = vadd.f32 %v3554_v31, %v1866_v32  ;;  %v1839_v10 = vadd.f32 %v3557_v37, %v1810_v58  ;;  %v2141_v47 = vlaneseq }
 0x5b2   :  { %v2067_v29 = vmul.f32 %v3576_v63, %v2026_v21  ;;  %v1945_v7 = vadd.f32 %v1944_v54, %v1916_v40  ;;  %v1976_v6 = vpop.f32.mrf.mxu1  ;;  %v2037_v45 = vmax.f32 %v1892_v9, 0.0 }
 0x5b3   :  { %v2041_v30 = vmax.f32 %v1895_v5, 0.0  ;;  %v1868_v33 = vadd.f32 %v3559_v38, %v1839_v10 }
 0x5b4   :  { %v1974_v60 = vadd.f32 %v1973_v59, %v1945_v7  ;;  %v2100_v15 = vadd.f32 %v2099_v8, %v2067_v29  ;;  %v2078_v62 = vmul.f32 %v3571_v14, %v2037_v45 }
 0x5b5   :  { %v2082_v37 = vmul.f32 %v3571_v14, %v2041_v30 }
 0x5b6   :  { %v2003_v16 = vadd.f32 %v2002_v22, %v1974_v60  ;;  %2101 = vadd.xlane.f32.xlu2 %v2100_v15  ;;  %v2114_v13 = vadd.f32 %v3508_v43, %v2078_v62 }
 0x5b7   :  { %v1918_v35 = vpop.f32.mrf.mxu3 }
 0x5b8   :  { %v2030_v23 = vmax.f32 %v2003_v16, 0.0  ;;  %v1919_v4 = vadd.f32 %v1918_v35, %v3567_v36  ;;  %v2005_v41 = vpop.f32.mrf.mxu2  ;;  %v2119_v16 = vadd.f32 %v3514_v53, %v2082_v37 }
 0x5b9   :  { %v1949_v54 = vpop.f32.mrf.mxu0 }
 0x5ba   :  { %v2071_v17 = vmul.f32 %v3576_v63, %v2030_v23  ;;  %v1948_v46 = vadd.f32 %v1947_v20, %v1919_v4  ;;  %v1978_v19 = vpop.f32.mrf.mxu1  ;;  %v1897_v20 = vadd.f32 %v3563_v42, %v1868_v33 }
 0x5bc   :  { %v1977_v51 = vadd.f32 %v1976_v6, %v1948_v46  ;;  %v2105_v26 = vadd.f32 %v2104_v18, %v2071_v17  ;;  %v2045_v6 = vmax.f32 %v1897_v20, 0.0 }
 0x5be   :  { %v2006_v52 = vadd.f32 %v2005_v41, %v1977_v51  ;;  %2106 = vadd.xlane.f32.xlu0 %v2105_v26  ;;  %v2086_v1 = vmul.f32 %v3571_v14, %v2045_v6  ;;  %v2131_v26 = vpop.permute.xlu2 %2130  ;;  %v3634_v14 = vand.u32 127, %v2141_v47 }
 0x5bf   :  { %v1920_v61 = vpop.f32.mrf.mxu3 }
 0x5c0   :  { %v2034_v49 = vmax.f32 %v2006_v52, 0.0  ;;  %v1921_v28 = vadd.f32 %v1920_v61, %v3567_v36  ;;  %v2007_v59 = vpop.f32.mrf.mxu2 }
 0x5c1   :  { %v1952_v40 = vpop.f32.mrf.mxu0 }
 0x5c2   :  { %v2075_v39 = vmul.f32 %v3576_v63, %v2034_v49  ;;  %v1950_v57 = vadd.f32 %v1949_v54, %v1921_v28  ;;  %v1981_v50 = vpop.f32.mrf.mxu1 }
 0x5c4   :  { %v1979_v12 = vadd.f32 %v1978_v19, %v1950_v57  ;;  %v2110_v3 = vadd.f32 %v2109_v48, %v2075_v39 }
 0x5c6   :  { %v2008_v21 = vadd.f32 %v2007_v59, %v1979_v12  ;;  %2111 = vadd.xlane.f32.xlu1 %v2110_v3 }
 0x5c7   :  { %v1923_v27 = vpop.f32.mrf.mxu3 }
 0x5c8   :  { %v2038_v22 = vmax.f32 %v2008_v21, 0.0  ;;  %v1924_v24 = vadd.f32 %v1923_v27, %v3567_v36  ;;  %v2010_v7 = vpop.f32.mrf.mxu2 }
 0x5c9   :  { %v1954_v43 = vpop.f32.mrf.mxu0 }
 0x5ca   :  { %v2079_v0 = vmul.f32 %v3576_v63, %v2038_v22  ;;  %v1953_v29 = vadd.f32 %v1952_v40, %v1924_v24  ;;  %v1983_v35 = vpop.f32.mrf.mxu1 }
 0x5cc   :  { %v1982_v31 = vadd.f32 %v1981_v50, %v1953_v29  ;;  %v2115_v8 = vadd.f32 %v2114_v13, %v2079_v0 }
 0x5ce   :  { %v2011_v60 = vadd.f32 %v2010_v7, %v1982_v31  ;;  %2116 = vadd.xlane.f32.xlu1 %v2115_v8 }
 0x5cf   :  { %v1925_v15 = vpop.f32.mrf.mxu3 }
 0x5d0   :  { %v2042_v44 = vmax.f32 %v2011_v60, 0.0  ;;  %v1926_v34 = vadd.f32 %v1925_v15, %v3567_v36  ;;  %v2012_v41 = vpop.f32.mrf.mxu2  ;;  %v2124_v36 = vadd.f32 %v3519_v2, %v2086_v1 }
 0x5d2   :  { %v2083_v38 = vmul.f32 %v3576_v63, %v2042_v44  ;;  %v1955_v11 = vadd.f32 %v1954_v43, %v1926_v34 }
 0x5d4   :  { %v1984_v23 = vadd.f32 %v1983_v35, %v1955_v11  ;;  %v2120_v4 = vadd.f32 %v2119_v16, %v2083_v38 }
 0x5d6   :  { %v2013_v42 = vadd.f32 %v2012_v41, %v1984_v23  ;;  %2121 = vadd.xlane.f32.xlu1 %v2120_v4 }
 0x5d8   :  { %v2046_v56 = vmax.f32 %v2013_v42, 0.0 }
 0x5da   :  { %v2087_v25 = vmul.f32 %v3576_v63, %v2046_v56 }
 0x5dc   :  { %v2125_v17 = vadd.f32 %v2124_v36, %v2087_v25 }
 0x5de   :  { %2126 = vadd.xlane.f32.xlu2 %v2125_v17 }
 0x619   :  { %v2092_v46 = vpop.xlane.xlu1 %2091 }
 0x61a   :  { %v2133_v19 = vadd.f32 %v2131_v26, %v2092_v46 }
 0x61c   :  { %v2154_v48 = vperm.slane %v2133_v19, %v3634_v14 }
 0x621   :  { %v2097_v18 = vpop.xlane.xlu1 %2096 }
 0x622   :  { %v2134_v55 = vadd.f32 %v2131_v26, %v2097_v18 }
 0x624   :  { %v2155_v2 = vperm.slane %v2134_v55, %v3634_v14 }
 0x626   :  { %v2162_v39 = vsel %vm589_vm6, %v2155_v2, %v2154_v48 }
 0x629   :  { %v2102_v9 = vpop.xlane.xlu2 %2101 }
 0x62a   :  { %v2135_v52 = vadd.f32 %v2131_v26, %v2102_v9 }
 0x62c   :  { %v2156_v45 = vperm.slane %v2135_v52, %v3634_v14 }
 0x62e   :  { %v2163_v12 = vsel %vm585_vm4, %v2156_v45, %v2162_v39 }
 0x631   :  { %v2107_v54 = vpop.xlane.xlu0 %2106 }
 0x632   :  { %v2136_v61 = vadd.f32 %v2131_v26, %v2107_v54 }
 0x634   :  { %v2157_v32 = vperm.slane %v2136_v61, %v3634_v14 }
 0x636   :  { %v2164_v5 = vsel %vm591_vm7, %v2157_v32, %v2163_v12 }
 0x639   :  { %v2112_v51 = vpop.xlane.xlu1 %2111 }
 0x63a   :  { %v2137_v49 = vadd.f32 %v2131_v26, %v2112_v51 }
 0x63c   :  { %v2158_v58 = vperm.slane %v2137_v49, %v3634_v14 }
 0x63e   :  { %v2165_v21 = vsel %vm597_vm9, %v2158_v58, %v2164_v5 }
 0x641   :  { %v2117_v53 = vpop.xlane.xlu1 %2116 }
 0x642   :  { %v2138_v28 = vadd.f32 %v2131_v26, %v2117_v53  ;;  %v2142_v53 = vshrl.u32 %v2141_v47, 7 }
 0x644   :  { %v2159_v57 = vperm.slane %v2138_v28, %v3634_v14  ;;  %vm2145_vm8 = vcmp.eq.s32.totalorder %v2142_v53, %v3634_v14 }
 0x646   :  { %v2166_v27 = vsel %vm603_vm11, %v2159_v57, %v2165_v21 }
 0x649   :  { %v2122_v63 = vpop.xlane.xlu1 %2121 }
 0x64a   :  { %v2139_v59 = vadd.f32 %v2131_v26, %v2122_v63 }
 0x64c   :  { %v2160_v3 = vperm.slane %v2139_v59, %v3634_v14 }
 0x64e   :  { %v2167_v22 = vsel %vm609_vm14, %v2160_v3, %v2166_v27 }
 0x651   :  { %v2127_v62 = vpop.xlane.xlu2 %2126 }
 0x652   :  { %v2140_v10 = vadd.f32 %v2131_v26, %v2127_v62 }
 0x654   :  { %v2161_v40 = vperm.slane %v2140_v10, %v3634_v14 }
 0x656   :  { %v2169_v24 = vsel %vm2168_vm3, %v2161_v40, %v2167_v22 }
 0x657   :  { %v2182_v50 = vsel %vm313_vm2, %v2169_v24, -inf  ;;  %v2171_v9 = vsel %vm2145_vm8, %v2169_v24, 0.0 }
 0x658   :  { %2183 = vmax.xlane.f32.xlu1 %v2182_v50  ;;  %v2172_v54 = vsel %vm313_vm2, %v2171_v9, 0.0 }
 0x6cb   :  { %v3652_v13 = vpop.xlane.xlu1 %2183 }
 0x6cc   :  { %v2189_v30 = vperm.slane %v3652_v13, 3  ;;  %v2187_v33 = vperm.slane %v3652_v13, 1  ;;  %v2186_v0 = vperm.slane %v3652_v13, 0  ;;  %v2193_v8 = vperm.slane %v3652_v13, 7 }
 0x6cd   :  { %v2188_v37 = vperm.slane %v3652_v13, 2  ;;  %v2190_v11 = vperm.slane %v3652_v13, 4  ;;  %v2191_v1 = vperm.slane %v3652_v13, 5  ;;  %v2192_v36 = vperm.slane %v3652_v13, 6 }
 0x6ce   :  { %v2205_v29 = vsub.f32 %v2136_v61, %v2189_v30  ;;  %v2203_v7 = vsub.f32 %v2134_v55, %v2187_v33  ;;  %v2202_v31 = vsub.f32 %v2133_v19, %v2186_v0  ;;  %v2209_v44 = vsub.f32 %v2140_v10, %v2193_v8 }
 0x6cf   :  { %v2204_v34 = vsub.f32 %v2135_v52, %v2188_v37  ;;  %v2206_v23 = vsub.f32 %v2137_v49, %v2190_v11  ;;  %v2207_v56 = vsub.f32 %v2138_v28, %v2191_v1  ;;  %v2208_v46 = vsub.f32 %v2139_v59, %v2192_v36 }
 0x6d0   :  { %v2216_v20 = vmul.f32 1.442695, %v2205_v29  ;;  %v2212_v60 = vmul.f32 1.442695, %v2203_v7  ;;  %v2210_v15 = vmul.f32 1.442695, %v2202_v31 }
 0x6d1   :  { %v2224_v43 = vmul.f32 1.442695, %v2209_v44  ;;  %v2214_v38 = vmul.f32 1.442695, %v2204_v34  ;;  %v2218_v41 = vmul.f32 1.442695, %v2206_v23 }
 0x6d2   :  { %2995 = vpow2.f32 %v2216_v20  ;;  %v2220_v25 = vmul.f32 1.442695, %v2207_v56  ;;  %v2222_v18 = vmul.f32 1.442695, %v2208_v46 }
 0x6d3   :  { %2997 = vpow2.f32 %v2212_v60 }
 0x6d4   :  { %2999 = vpow2.f32 %v2210_v15 }
 0x6d5   :  { %3001 = vpow2.f32 %v2224_v43 }
 0x6d6   :  { %3003 = vpow2.f32 %v2214_v38 }
 0x6d7   :  { %3005 = vpow2.f32 %v2218_v41 }
 0x6d8   :  { %v2996_v6 = vpop.eup %2995  ;;  %3007 = vpow2.f32 %v2220_v25 }
 0x6d9   :  { %v2998_v16 = vpop.eup %2997  ;;  %2244 = vperm.xlu2 %2985, %v2996_v6   ;;  %3009 = vpow2.f32 %v2222_v18 }
 0x6da   :  { %v3000_v35 = vpop.eup %2999  ;;  %2238 = vperm.xlu0 %2987, %v2998_v16  }
 0x6db   :  { %2235 = vperm.xlu1 %2986, %v3000_v35   ;;  %v3002_v4 = vpop.eup %3001 }
 0x6dc   :  { %v3004_v42 = vpop.eup %3003 }
 0x6dd   :  { %v3006_v17 = vpop.eup %3005 }
 0x6de   :  { %v3008_v51 = vpop.eup %3007 }
 0x6df   :  { %v3010_v26 = vpop.eup %3009 }
 0x6e1   :  { %2256 = vperm.xlu2 %2985, %v3002_v4  }
 0x6e3   :  { %2241 = vperm.xlu1 %2986, %v3004_v42  }
 0x6eb   :  { %2247 = vperm.xlu1 %2986, %v3006_v17  }
 0x6f3   :  { %2250 = vperm.xlu1 %2986, %v3008_v51  }
 0x6fb   :  { %2253 = vperm.xlu1 %2986, %v3010_v26  }
 0x725   :  { %2173 = vadd.xlane.f32.xlu1 %v2172_v54 }
 0x733   :  { %v2245_v61 = vpop.permute.xlu2 %2244 }
 0x734   :  { %v2261_v32 = vperm.slane %v2245_v61, %v3634_v14 }
 0x73b   :  { %v2257_v39 = vpop.permute.xlu2 %2256 }
 0x73c   :  { %v2265_v5 = vperm.slane %v2257_v39, %v3634_v14 }
 0x74c   :  { %v2239_v63 = vpop.permute.xlu0 %2238 }
 0x74d   :  { %v2236_v55 = vpop.permute.xlu1 %2235  ;;  %v2259_v49 = vperm.slane %v2239_v63, %v3634_v14 }
 0x74e   :  { %v2258_v2 = vperm.slane %v2236_v55, %v3634_v14 }
 0x750   :  { %v2266_v47 = vsel %vm589_vm6, %v2259_v49, %v2258_v2 }
 0x755   :  { %v2242_v52 = vpop.permute.xlu1 %2241 }
 0x756   :  { %v2260_v45 = vperm.slane %v2242_v52, %v3634_v14 }
 0x758   :  { %v2267_v59 = vsel %vm585_vm4, %v2260_v45, %v2266_v47 }
 0x759   :  { %v2268_v57 = vsel %vm591_vm7, %v2261_v32, %v2267_v59 }
 0x75d   :  { %v2248_v19 = vpop.permute.xlu1 %2247 }
 0x75e   :  { %v2262_v48 = vperm.slane %v2248_v19, %v3634_v14 }
 0x760   :  { %v2269_v3 = vsel %vm597_vm9, %v2262_v48, %v2268_v57 }
 0x765   :  { %v2251_v28 = vpop.permute.xlu1 %2250 }
 0x766   :  { %v2263_v58 = vperm.slane %v2251_v28, %v3634_v14 }
 0x768   :  { %v2270_v10 = vsel %vm603_vm11, %v2263_v58, %v2269_v3 }
 0x76d   :  { %v2254_v12 = vpop.permute.xlu1 %2253 }
 0x76e   :  { %v2264_v62 = vperm.slane %v2254_v12, %v3634_v14 }
 0x770   :  { %v2271_v21 = vsel %vm609_vm14, %v2264_v62, %v2270_v10 }
 0x771   :  { %v2272_v40 = vsel %vm2168_vm3, %v2265_v5, %v2271_v21 }
 0x772   :  { %v2274_v27 = vsel %vm313_vm2, %v2272_v40, 0.0  ;;  %vm2290_vm2 = vcmask 0  }
 0x773   :  { %2275 = vadd.xlane.f32.xlu0 %v2274_v27 }
 0x798   :  { %v2174_v22 = vpop.xlane.xlu1 %2173 }
 0x799   :  { %v2175_v50 = vrot.slane %v2174_v22, 4 }
 0x79b   :  { %v2176_v30 = vadd.f32 %v2175_v50, %v2174_v22 }
 0x79d   :  { %v2177_v29 = vrot.slane %v2176_v30, 2 }
 0x79f   :  { %v2178_v31 = vadd.f32 %v2177_v29, %v2176_v30 }
 0x7a1   :  { %v2179_v20 = vrot.slane %v2178_v31, 1 }
 0x7a3   :  { %v2180_v44 = vadd.f32 %v2179_v20, %v2178_v31 }
 0x7a5   :  { %v2181_v6 = vmul.f32 0.125, %v2180_v44 }
 0x7e6   :  { %v2276_v24 = vpop.xlane.xlu0 %2275 }
 0x7e7   :  { %3011 = vlog2.f32 %v2276_v24 }
 0x7ed   :  { %v3012_v33 = vpop.eup %3011 }
 0x7ee   :  { %v2278_v0 = vmul.f32 0.6931472, %v3012_v33 }
 0x7f0   :  { %v2279_v7 = vadd.f32 %v2278_v0, %v3652_v13 }
 0x7f2   :  { %v2280_v14 = vrot.slane %v2279_v7, 4 }
 0x7f4   :  { %v2281_v8 = vadd.f32 %v2280_v14, %v2279_v7 }
 0x7f6   :  { %v2282_v37 = vrot.slane %v2281_v8, 2 }
 0x7f8   :  { %v2283_v60 = vadd.f32 %v2282_v37, %v2281_v8 }
 0x7fa   :  { %v2284_v15 = vrot.slane %v2283_v60, 1 }
 0x7fc   :  { %v2285_v34 = vadd.f32 %v2284_v15, %v2283_v60 }
 0x7fe   :  { %v2286_v43 = vmul.f32 0.125, %v2285_v34 }
 0x800   :  { %v2842_v38 = vadd.f32 -2.0794415, %v2286_v43 }
 0x802   :  { %v2288_v11 = vsub.f32 %v2181_v6, %v2842_v38 }
 0x804   :  { %v2289_v13 = vsub.f32 0.0, %v2288_v11 }
 0x806   :  { %2291 = vst.msk [vmem:[#allocation10] sm:$0x1] %vm2290_vm2, %v2289_v13 }
 0x807   :  { %2302 = dma.vmem_to_hbm [thread:$0]  %s2298_s14, 16, %s2300_s17, [#allocation4]  }
 0x808   :  { %3139 = dma.done.wait [#allocation4], 16  }
 0x809   :  { %3140 = vsyncadd [#allocation4], 4294967280 }
 0x80a   :  { %2307 = vsyncpa [#allocation3], 1 }
 0x80b   :  { %2308 = vsyncpa [#allocation6], 1 }
 0x80c   :  { %2309 = vsyncpa [#allocation9], 1 }
 0x80d   :  { %2310 = vsyncpa [#allocation4], 1 }

</bundles_post_ra>
